<compile_context>
chip_gen: v7x
topology: tpu7x:2x2x1
jax: 0.10.0
libtpu: 0.0.40
codegen_flags: <defaults>
</compile_context>

<pallas_src>
import jax
import jax.numpy as jnp
from jax.experimental import pallas as pl
from jax.experimental.pallas import tpu as pltpu

NEG = 1e12  # matches PyTorch's 1000000000000.0
PREC = jax.lax.Precision.HIGHEST


# ----------------------------- Pallas kernel ------------------------------ #
def biaffine_kernel(se_ref, negcol_ref, eT_ref, w1_ref, out_ref):
    """One (batch b, x-tile) grid step: logits[b, :, x0:x0+TX, :] for all O heads."""
    O = out_ref.shape[1]
    TX = out_ref.shape[2]
    Lp = out_ref.shape[3]
    Hp = eT_ref.shape[1]
    cdt = w1_ref.dtype

    # first-stage matmul, all O heads at once; rank-1 row/col terms, constants, the row
    # mask and its -1e12 sentinel are already folded into the SE / w1 padding lanes
    P = jnp.dot(se_ref[0], w1_ref[...],
                preferred_element_type=jnp.float32).astype(cdt)        # (TX, O*Hp)

    # additive column-mask + tril penalty, built once per tile from iota (no HBM stream)
    x0 = pl.program_id(1) * TX
    row_ids = jax.lax.broadcasted_iota(jnp.int32, (TX, Lp), 0) + x0
    col_ids = jax.lax.broadcasted_iota(jnp.int32, (TX, Lp), 1)
    addm = negcol_ref[0] + jnp.where(row_ids > col_ids, -NEG, 0.0)      # (TX, Lp) f32

    eT = eT_ref[0]                                                      # (Hp, Lp)
    for o in range(O):                                                  # O is small & static
        p_o = P[:, o * Hp:(o + 1) * Hp]                                 # lane-aligned slice
        logit = jnp.dot(p_o, eT, preferred_element_type=jnp.float32)    # (TX, Lp)
        out_ref[0, o] = (logit + addm).astype(out_ref.dtype)            # 1 VPU add + store


def _round_up(v, m):
    return (v + m - 1) // m * m


def biaffine_pallas(enc, mask, Ws, bs, We, be, W1, W2, *,
                    compute_dtype=jnp.bfloat16, out_dtype=jnp.float32):
    """enc: (B, L, 2H) bi-LSTM output, mask: (B, L) {0,1}.

    Returns PADDED logits (B, O, Lp, Lp), Lp = round_up(L, 128).  The valid region is
    [:, :, :L, :L]; padded rows/cols carry the same -1e12 sentinel as masked positions.
    No unpad copy is performed here (it would roughly double the HBM traffic of a
    write-bound kernel) — crop in the consumer if it needs exactly (B, O, L, L).
    """
    B, L, H2 = enc.shape
    H = H2 // 2
    O = W1.shape[1]
    assert H2 == 2 * H
    assert W1.shape == (H + 1, O, H + 1)
    assert W2.shape == (2 * H + 3, O)

    f32 = jnp.float32
    cdt = compute_dtype
    cbytes = jnp.dtype(cdt).itemsize
    obytes = jnp.dtype(out_dtype).itemsize

    # Hp lanes per head: H data lanes + [mask, inv-mask | rcol_0..O-1, mask] extra lanes
    Hp = _round_up(H + O + 2, 128)
    Lp = _round_up(max(L, 1), 128)

    # ---- generation-aware tile / VMEM-limit selection ----
    try:
        vmem_cap = int(pltpu.get_tpu_info().vmem_capacity_bytes)   # 64 MiB v7x, 128 MiB v5e/v6e
    except Exception:
        vmem_cap = 64 << 20
    budget = max(24 << 20, min(vmem_cap - (16 << 20), 96 << 20))

    def vmem_need(tx):
        return (2 * O * tx * Lp * obytes           # double-buffered output tile
                + 2 * tx * 2 * Hp * cbytes         # SE x-tiles
                + 2 * Hp * Lp * cbytes             # e^T per-batch block
                + 2 * 2 * Hp * O * Hp * cbytes     # fused weight (worst-case 2 buffers)
                + tx * O * Hp * (4 + cbytes)       # P (f32 acc + compute-dtype copy)
                + 3 * tx * Lp * 4)                 # logit / addm / iota temporaries

    TX = 128
    for cand in (512, 256, 128):                   # TX=512 only fits the 128 MiB parts
        if Lp % cand == 0 and vmem_need(cand) <= budget:
            TX = cand
            break
    NX = Lp // TX
    vmem_limit = int(min(vmem_cap - (4 << 20), max(vmem_need(TX) + (8 << 20), 32 << 20)))

    # ---- XLA-side precompute (tiny vs the O*Lp^2 kernel output) ----
    m = mask.astype(f32)                                               # (B, L)
    mm = m[..., None]
    enc_f = enc.astype(f32)
    s = jax.nn.relu(jnp.dot(enc_f, Ws.astype(f32), precision=PREC) + bs)    # (B, L, H)
    e = jax.nn.relu(jnp.dot(enc_f, We.astype(f32), precision=PREC) + be)    # (B, L, H)
    # rank-1 column term rcol[y, o] = e[y] @ W1[H, o, :H] + s[y] @ W2[:H, o]
    rcol = (jnp.einsum('blh,oh->blo', e, W1[H, :, :H].astype(f32), precision=PREC)
            + jnp.dot(s, W2[:H].astype(f32), precision=PREC))               # (B, L, O)

    # x-side operand: [ m*s | m | (1-m) | 0pad || m*e | 0pad ]   (2*Hp lanes)
    SE = jnp.zeros((B, Lp, 2 * Hp), f32)
    SE = SE.at[:, :L, :H].set(mm * s)
    SE = SE.at[:, :L, H].set(m)
    SE = SE.at[:, :, H + 1].set(1.0)                 # padded rows behave like masked rows
    SE = SE.at[:, :L, H + 1].set(1.0 - m)            # (1 - row_mask) sentinel selector
    SE = SE.at[:, :L, Hp:Hp + H].set(mm * e)

    # y-side operand rows (column mask folded in): [ m*e | m | m*rcol | m | 0pad ]
    E = jnp.zeros((B, Lp, Hp), f32)
    E = E.at[:, :L, :H].set(mm * e)
    E = E.at[:, :L, H].set(m)
    E = E.at[:, :L, H + 1:H + 1 + O].set(mm * rcol)
    E = E.at[:, :L, H + 1 + O].set(m)
    eT = jnp.transpose(E, (0, 2, 1))                                   # (B, Hp, Lp)

    # additive column-mask term: -1e12 on masked / padded y
    negcol = jnp.full((B, 1, Lp), -NEG, f32).at[:, 0, :L].set((-NEG) * (1.0 - m))

    # fused weight (2*Hp, O*Hp): bilinear core + rank-1 row term (+consts) + rcol
    # selector + (-1e12)*(1-row_mask) sentinel, each in its own lane-aligned column.
    W1f = W1.astype(f32)
    W2f = W2.astype(f32)
    const_o = W1f[H, :, H] + W2f[H] + W2f[2 * H + 1] + W2f[2 * H + 2]       # (O,)
    w1 = jnp.zeros((2 * Hp, O * Hp), f32)
    for o in range(O):
        co = o * Hp
        w1 = w1.at[:H, co:co + H].set(W1f[:H, o, :H])                  # s @ W1core @ e
        w1 = w1.at[:H, co + H].set(W1f[:H, o, H])                      # row term, s part
        w1 = w1.at[Hp:Hp + H, co + H].set(W2f[H + 1:2 * H + 1, o])     # row term, e part
        w1 = w1.at[H, co + H].set(const_o[o])                          # row-term constant
        w1 = w1.at[H, co + H + 1 + o].set(1.0)                         # selects rcol_o (y side)
        w1 = w1.at[H + 1, co + H + 1 + O].set(-NEG)                    # -1e12*(1-row_mask)

    flops = 2 * B * Lp * (2 * Hp) * (O * Hp) + 2 * B * O * Lp * Hp * Lp
    bytes_accessed = (B * Lp * 2 * Hp * cbytes + B * Hp * Lp * cbytes + B * Lp * 4
                      + 2 * Hp * O * Hp * cbytes + B * O * Lp * Lp * obytes)

    # TODO(synk): mark the fused-weight BlockSpec pipeline_mode=pl.Buffered(1)
    # (grid-constant input; second buffer is pure VMEM waste) once single-buffering
    # is verified on the deployed jax version.
    out = pl.pallas_call(
        biaffine_kernel,
        out_shape=jax.ShapeDtypeStruct((B, O, Lp, Lp), out_dtype),
        grid_spec=pltpu.PrefetchScalarGridSpec(
            num_scalar_prefetch=0,
            grid=(B, NX),
            in_specs=[
                pl.BlockSpec((1, TX, 2 * Hp), lambda b, x: (b, x, 0)),    # SE x-tile
                pl.BlockSpec((1, 1, Lp), lambda b, x: (b, 0, 0)),         # col-mask add term
                pl.BlockSpec((1, Hp, Lp), lambda b, x: (b, 0, 0)),        # E^T (per batch)
                pl.BlockSpec((2 * Hp, O * Hp), lambda b, x: (0, 0)),      # fused weight
            ],
            out_specs=pl.BlockSpec((1, O, TX, Lp), lambda b, x: (b, 0, x, 0)),
        ),
        compiler_params=pltpu.CompilerParams(
            dimension_semantics=("parallel", "parallel"),
            vmem_limit_bytes=vmem_limit),
        cost_estimate=pl.CostEstimate(flops=flops, transcendentals=0,
                                      bytes_accessed=bytes_accessed),
    )(SE.astype(cdt), negcol, eT.astype(cdt), w1.astype(cdt))
    return out


# ------------------------------- JAX glue --------------------------------- #
def sinusoidal_position_embedding(x):
    """merge_mode='add', custom_position_ids=False."""
    B, L, D = x.shape
    pos = jnp.arange(L, dtype=jnp.float32)[None]                      # (1, L)
    idx = jnp.arange(D // 2, dtype=jnp.float32)
    idx = jnp.power(10000.0, -2.0 * idx / D)
    emb = jnp.einsum('bn,d->bnd', pos, idx)                           # (1, L, D//2)
    emb = jnp.stack([jnp.sin(emb), jnp.cos(emb)], axis=-1)
    emb = jnp.reshape(emb, (-1, L, D))
    return x + emb


def lstm_dir(x, params):
    """Single-direction LSTM, PyTorch gate order (i, f, g, o)."""
    Wih, Whh, bih, bhh = params
    B, L, H = x.shape

    def step(carry, xt):
        h, c = carry
        g = xt @ Wih.T + bih + h @ Whh.T + bhh
        i, f, gg, o = jnp.split(g, 4, axis=-1)
        i = jax.nn.sigmoid(i)
        f = jax.nn.sigmoid(f)
        gg = jnp.tanh(gg)
        o = jax.nn.sigmoid(o)
        c = f * c + i * gg
        h = o * jnp.tanh(c)
        return (h, c), h

    h0 = jnp.zeros((B, H), x.dtype)
    c0 = jnp.zeros((B, H), x.dtype)
    _, hs = jax.lax.scan(step, (h0, c0), jnp.swapaxes(x, 0, 1))
    return jnp.swapaxes(hs, 0, 1)                                     # (B, L, H)


def bilstm(x, fwd_p, bwd_p):
    hf = lstm_dir(x, fwd_p)
    hb = lstm_dir(x[:, ::-1], bwd_p)[:, ::-1]
    return jnp.concatenate([hf, hb], axis=-1)                         # (B, L, 2H)


# --------------------------- pure-JAX reference ---------------------------- #
def biaffine_ref(enc, mask, Ws, bs, We, be, W1, W2):
    start = jax.nn.relu(jnp.dot(enc, Ws, precision=PREC) + bs)
    end = jax.nn.relu(jnp.dot(enc, We, precision=PREC) + be)
    ones = jnp.ones_like(start[..., :1])
    start = jnp.concatenate([start, ones], -1)
    end = jnp.concatenate([end, ones], -1)
    B, L, D = start.shape
    sc = jnp.broadcast_to(start[:, None], (B, L, L, D))
    ec = jnp.broadcast_to(end[:, :, None], (B, L, L, D))
    cat = jnp.concatenate([sc, ec], -1)
    cat = jnp.concatenate([cat, jnp.ones_like(cat[..., :1])], -1)
    l1 = jnp.einsum('bxi,ioj,byj->bxyo', start, W1, end, precision=PREC)
    l2 = jnp.einsum('bijy,yo->bijo', cat, W2, precision=PREC)
    logits = jnp.transpose(l1 + l2, (0, 3, 1, 2))
    m = mask.astype(logits.dtype)
    mx = m[:, None, :, None]
    my = m[:, None, None, :]
    logits = logits * mx + (-NEG) * (1 - mx)
    logits = logits * my + (-NEG) * (1 - my)
    tril = jnp.tril(jnp.ones((L, L), logits.dtype), k=-1)
    logits = logits - tril * NEG
    return logits


# ---------------------------------- main ----------------------------------- #
if __name__ == "__main__":
    B, L = 2, 8
    H = 32            # hidden_size == dim_in == dim_hid (required by module shape algebra)
    O = 4             # categories_size
    VOCAB = 100

    key = jax.random.PRNGKey(0)
    ks = jax.random.split(key, 16)

    input_ids = jax.random.randint(ks[0], (B, L), 0, VOCAB)
    attention_mask = jnp.array([[1] * L, [1] * (L - 3) + [0] * 3], dtype=jnp.int32)
    token_type_ids = jnp.zeros((B, L), dtype=jnp.int32)

    # TODO(synk): pretrained BERT encoder not reproducible here; deterministic
    # embedding-sum stand-in produces last_hidden_state of shape (B, L, H).
    tok_emb = jax.random.normal(ks[1], (VOCAB, H)) * 0.1
    typ_emb = jax.random.normal(ks[2], (2, H)) * 0.1
    bert_encoder = tok_emb[input_ids] + typ_emb[token_type_ids]       # (B, L, H)

    # Biaffine parameters (deterministic synthetic init)
    Ws = jax.random.normal(ks[3], (2 * H, H)) * 0.05
    bs = jax.random.normal(ks[4], (H,)) * 0.05
    We = jax.random.normal(ks[5], (2 * H, H)) * 0.05
    be = jax.random.normal(ks[6], (H,)) * 0.05
    W1 = jax.random.normal(ks[7], (H + 1, O, H + 1)) * 0.05
    W2 = jax.random.normal(ks[8], (2 * H + 3, O)) * 0.05

    def lstm_params(k):
        k1, k2, k3, k4 = jax.random.split(k, 4)
        return (jax.random.normal(k1, (4 * H, H)) * 0.05,
                jax.random.normal(k2, (4 * H, H)) * 0.05,
                jax.random.normal(k3, (4 * H,)) * 0.05,
                jax.random.normal(k4, (4 * H,)) * 0.05)
    fwd_p = lstm_params(ks[9])
    bwd_p = lstm_params(ks[10])

    # Forward pass (abPosition=True)
    x = sinusoidal_position_embedding(bert_encoder)
    encoder_rep = bilstm(x, fwd_p, bwd_p)                             # (B, L, 2H)

    ref = biaffine_ref(encoder_rep, attention_mask, Ws, bs, We, be, W1, W2)
    Lp = _round_up(L, 128)

    # 1) f32 compute path: tight check of the folded algebra / in-kernel masking.
    pad_f32 = biaffine_pallas(encoder_rep, attention_mask, Ws, bs, We, be, W1, W2,
                              compute_dtype=jnp.float32)
    pad_f32 = jax.block_until_ready(pad_f32)
    assert pad_f32.shape == (B, O, Lp, Lp), pad_f32.shape
    err = float(jnp.max(jnp.abs(pad_f32[:, :, :L, :L] - ref)))
    assert jnp.allclose(pad_f32[:, :, :L, :L], ref, rtol=5e-3, atol=5e-3), err

    # 2) default bf16-MXU-operand path (f32 accumulation, f32 epilogue / f32 store).
    pad = jax.block_until_ready(
        biaffine_pallas(encoder_rep, attention_mask, Ws, bs, We, be, W1, W2))
    assert pad.shape == (B, O, Lp, Lp), pad.shape
    err = float(jnp.max(jnp.abs(pad[:, :, :L, :L] - ref)))
    assert jnp.allclose(pad[:, :, :L, :L], ref, rtol=2e-2, atol=2e-2), err

    # 3) bf16 output path (halves the dominant O*Lp^2 HBM write).
    #    NOTE: -1e12 / -2e12 sentinels round by ~0.1%; downstream must accept bf16 logits.
    pad_b16 = jax.block_until_ready(
        biaffine_pallas(encoder_rep, attention_mask, Ws, bs, We, be, W1, W2,
                        out_dtype=jnp.bfloat16))
    assert pad_b16.dtype == jnp.bfloat16
    b16 = pad_b16[:, :, :L, :L].astype(jnp.float32)
    err = float(jnp.max(jnp.abs(b16 - ref)))
    assert jnp.allclose(b16, ref, rtol=4e-2, atol=4e-2), err

    print("KERNEL_OK")
</pallas_src>

<mosaic_0001>
module attributes {stable_mosaic.version = 11 : i64} {
  func.func @biaffine_kernel(%arg0: i32, %arg1: i32, %arg2: memref<1x128x256xf32, #tpu.memory_space<vmem>>, %arg3: memref<1x1x128xf32, #tpu.memory_space<vmem>>, %arg4: memref<1x128x128xf32, #tpu.memory_space<vmem>>, %arg5: memref<256x512xf32, #tpu.memory_space<vmem>>, %arg6: memref<1x4x128x128xf32, #tpu.memory_space<vmem>>) attributes {dimension_semantics = [#tpu.dimension_semantics<parallel>, #tpu.dimension_semantics<parallel>], iteration_bounds = array<i64: 2, 1>, scalar_prefetch = 0 : i64, scratch_operands = 0 : i64, tpu.core_type = #tpu.core_type<tc>, window_params = [{transform_indices = @transform_0, window_bounds = array<i64: 1, 128, 256>}, {transform_indices = @transform_1, window_bounds = array<i64: 1, 1, 128>}, {transform_indices = @transform_2, window_bounds = array<i64: 1, 128, 128>}, {pipeline_mode = #tpu.pipeline_mode<synchronous>, transform_indices = @transform_3, window_bounds = array<i64: 256, 512>}, {transform_indices = @transform_4, window_bounds = array<i64: 1, 4, 128, 128>}]} {
    %c0 = arith.constant 0 : index
    %c0_0 = arith.constant 0 : index
    %c0_1 = arith.constant 0 : index
    %0 = vector.load %arg2[%c0, %c0_0, %c0_1] : memref<1x128x256xf32, #tpu.memory_space<vmem>>, vector<1x128x256xf32>
    %1 = vector.shape_cast %0 : vector<1x128x256xf32> to vector<128x256xf32>
    %c0_2 = arith.constant 0 : index
    %c0_3 = arith.constant 0 : index
    %2 = vector.load %arg5[%c0_2, %c0_3] : memref<256x512xf32, #tpu.memory_space<vmem>>, vector<256x512xf32>
    %cst = arith.constant dense<0.000000e+00> : vector<128x512xf32>
    %3 = tpu.matmul %1, %2, %cst {dimension_numbers = #tpu.dot_dimension_numbers<[1], [0], [0], [1], [0, 0, 1, 1], [], []>} : vector<128x256xf32>, vector<256x512xf32>, vector<128x512xf32> -> vector<128x512xf32>
    %c128_i32 = arith.constant 128 : i32
    %4 = arith.muli %arg1, %c128_i32 : i32
    %5 = tpu.iota {dimensions = array<i32: 0>} : vector<128x128xi32>
    %6 = vector.broadcast %4 : i32 to vector<128x128xi32>
    %7 = arith.addi %5, %6 : vector<128x128xi32>
    %8 = tpu.iota {dimensions = array<i32: 1>} : vector<128x128xi32>
    %c0_4 = arith.constant 0 : index
    %c0_5 = arith.constant 0 : index
    %c0_6 = arith.constant 0 : index
    %9 = vector.load %arg3[%c0_4, %c0_5, %c0_6] : memref<1x1x128xf32, #tpu.memory_space<vmem>>, vector<1x1x128xf32>
    %10 = vector.shape_cast %9 : vector<1x1x128xf32> to vector<1x128xf32>
    %11 = arith.cmpi sgt, %7, %8 : vector<128x128xi32>
    %cst_7 = arith.constant -9.99999995E+11 : f32
    %cst_8 = arith.constant 0.000000e+00 : f32
    %12 = vector.broadcast %cst_7 : f32 to vector<128x128xf32>
    %13 = vector.broadcast %cst_8 : f32 to vector<128x128xf32>
    %14 = arith.select %11, %12, %13 : vector<128x128xi1>, vector<128x128xf32>
    %15 = vector.broadcast %10 : vector<1x128xf32> to vector<128x128xf32>
    %16 = arith.addf %15, %14 : vector<128x128xf32>
    %c0_9 = arith.constant 0 : index
    %c0_10 = arith.constant 0 : index
    %c0_11 = arith.constant 0 : index
    %17 = vector.load %arg4[%c0_9, %c0_10, %c0_11] : memref<1x128x128xf32, #tpu.memory_space<vmem>>, vector<1x128x128xf32>
    %18 = vector.shape_cast %17 : vector<1x128x128xf32> to vector<128x128xf32>
    %19 = vector.extract_strided_slice %3 {offsets = [0, 0], sizes = [128, 128], strides = [1, 1]} : vector<128x512xf32> to vector<128x128xf32>
    %cst_12 = arith.constant dense<0.000000e+00> : vector<128x128xf32>
    %20 = tpu.matmul %19, %18, %cst_12 {dimension_numbers = #tpu.dot_dimension_numbers<[1], [0], [0], [1], [0, 0, 1, 1], [], []>} : vector<128x128xf32>, vector<128x128xf32>, vector<128x128xf32> -> vector<128x128xf32>
    %21 = arith.addf %20, %16 : vector<128x128xf32>
    %c0_13 = arith.constant 0 : index
    %c0_14 = arith.constant 0 : index
    %c0_15 = arith.constant 0 : index
    %c0_16 = arith.constant 0 : index
    %22 = vector.load %arg6[%c0_13, %c0_14, %c0_15, %c0_16] : memref<1x4x128x128xf32, #tpu.memory_space<vmem>>, vector<1x1x128x128xf32>
    %23 = vector.shape_cast %22 : vector<1x1x128x128xf32> to vector<128x128xf32>
    %24 = vector.shape_cast %21 : vector<128x128xf32> to vector<1x1x128x128xf32>
    tpu.vector_store %arg6[%c0_13, %c0_14, %c0_15, %c0_16], %24 {strides = array<i32>} : memref<1x4x128x128xf32, #tpu.memory_space<vmem>>, vector<1x1x128x128xf32>,
    %25 = vector.extract_strided_slice %3 {offsets = [0, 128], sizes = [128, 128], strides = [1, 1]} : vector<128x512xf32> to vector<128x128xf32>
    %cst_17 = arith.constant dense<0.000000e+00> : vector<128x128xf32>
    %26 = tpu.matmul %25, %18, %cst_17 {dimension_numbers = #tpu.dot_dimension_numbers<[1], [0], [0], [1], [0, 0, 1, 1], [], []>} : vector<128x128xf32>, vector<128x128xf32>, vector<128x128xf32> -> vector<128x128xf32>
    %27 = arith.addf %26, %16 : vector<128x128xf32>
    %c0_18 = arith.constant 0 : index
    %c1 = arith.constant 1 : index
    %c0_19 = arith.constant 0 : index
    %c0_20 = arith.constant 0 : index
    %28 = vector.load %arg6[%c0_18, %c1, %c0_19, %c0_20] : memref<1x4x128x128xf32, #tpu.memory_space<vmem>>, vector<1x1x128x128xf32>
    %29 = vector.shape_cast %28 : vector<1x1x128x128xf32> to vector<128x128xf32>
    %30 = vector.shape_cast %27 : vector<128x128xf32> to vector<1x1x128x128xf32>
    tpu.vector_store %arg6[%c0_18, %c1, %c0_19, %c0_20], %30 {strides = array<i32>} : memref<1x4x128x128xf32, #tpu.memory_space<vmem>>, vector<1x1x128x128xf32>,
    %31 = vector.extract_strided_slice %3 {offsets = [0, 256], sizes = [128, 128], strides = [1, 1]} : vector<128x512xf32> to vector<128x128xf32>
    %cst_21 = arith.constant dense<0.000000e+00> : vector<128x128xf32>
    %32 = tpu.matmul %31, %18, %cst_21 {dimension_numbers = #tpu.dot_dimension_numbers<[1], [0], [0], [1], [0, 0, 1, 1], [], []>} : vector<128x128xf32>, vector<128x128xf32>, vector<128x128xf32> -> vector<128x128xf32>
    %33 = arith.addf %32, %16 : vector<128x128xf32>
    %c0_22 = arith.constant 0 : index
    %c2 = arith.constant 2 : index
    %c0_23 = arith.constant 0 : index
    %c0_24 = arith.constant 0 : index
    %34 = vector.load %arg6[%c0_22, %c2, %c0_23, %c0_24] : memref<1x4x128x128xf32, #tpu.memory_space<vmem>>, vector<1x1x128x128xf32>
    %35 = vector.shape_cast %34 : vector<1x1x128x128xf32> to vector<128x128xf32>
    %36 = vector.shape_cast %33 : vector<128x128xf32> to vector<1x1x128x128xf32>
    tpu.vector_store %arg6[%c0_22, %c2, %c0_23, %c0_24], %36 {strides = array<i32>} : memref<1x4x128x128xf32, #tpu.memory_space<vmem>>, vector<1x1x128x128xf32>,
    %37 = vector.extract_strided_slice %3 {offsets = [0, 384], sizes = [128, 128], strides = [1, 1]} : vector<128x512xf32> to vector<128x128xf32>
    %cst_25 = arith.constant dense<0.000000e+00> : vector<128x128xf32>
    %38 = tpu.matmul %37, %18, %cst_25 {dimension_numbers = #tpu.dot_dimension_numbers<[1], [0], [0], [1], [0, 0, 1, 1], [], []>} : vector<128x128xf32>, vector<128x128xf32>, vector<128x128xf32> -> vector<128x128xf32>
    %39 = arith.addf %38, %16 : vector<128x128xf32>
    %c0_26 = arith.constant 0 : index
    %c3 = arith.constant 3 : index
    %c0_27 = arith.constant 0 : index
    %c0_28 = arith.constant 0 : index
    %40 = vector.load %arg6[%c0_26, %c3, %c0_27, %c0_28] : memref<1x4x128x128xf32, #tpu.memory_space<vmem>>, vector<1x1x128x128xf32>
    %41 = vector.shape_cast %40 : vector<1x1x128x128xf32> to vector<128x128xf32>
    %42 = vector.shape_cast %39 : vector<128x128xf32> to vector<1x1x128x128xf32>
    tpu.vector_store %arg6[%c0_26, %c3, %c0_27, %c0_28], %42 {strides = array<i32>} : memref<1x4x128x128xf32, #tpu.memory_space<vmem>>, vector<1x1x128x128xf32>,
    return
  }
  func.func @transform_0(%arg0: i32, %arg1: i32) -> (i32, i32, i32) {
    %c0_i32 = arith.constant 0 : i32
    %c0_i32_0 = arith.constant 0 : i32
    return %arg0, %arg1, %c0_i32 : i32, i32, i32
  }
  func.func @transform_1(%arg0: i32, %arg1: i32) -> (i32, i32, i32) {
    %c0_i32 = arith.constant 0 : i32
    %c0_i32_0 = arith.constant 0 : i32
    %c0_i32_1 = arith.constant 0 : i32
    return %arg0, %c0_i32, %c0_i32_0 : i32, i32, i32
  }
  func.func @transform_2(%arg0: i32, %arg1: i32) -> (i32, i32, i32) {
    %c0_i32 = arith.constant 0 : i32
    %c0_i32_0 = arith.constant 0 : i32
    %c0_i32_1 = arith.constant 0 : i32
    return %arg0, %c0_i32, %c0_i32_0 : i32, i32, i32
  }
  func.func @transform_3(%arg0: i32, %arg1: i32) -> (i32, i32) {
    %c0_i32 = arith.constant 0 : i32
    %c0_i32_0 = arith.constant 0 : i32
    %c0_i32_1 = arith.constant 0 : i32
    return %c0_i32, %c0_i32_0 : i32, i32
  }
  func.func @transform_4(%arg0: i32, %arg1: i32) -> (i32, i32, i32, i32) {
    %c0_i32 = arith.constant 0 : i32
    %c0_i32_0 = arith.constant 0 : i32
    %c0_i32_1 = arith.constant 0 : i32
    return %arg0, %c0_i32, %arg1, %c0_i32_0 : i32, i32, i32, i32
  }
}

</mosaic_0001>

<bundles_post_ra>
// kernel: tpu_custom_call.1
= control target key start
LH: loop header
LB: loop body
LE: loop exit
PB: predicated region body
PF: predicated region fallthrough
CT: control target
= control target key end

     0   :  { %s3341_s0 = inlined_call_operand.hbm [shape: f32[2,128,256], index: 0, kind: input, shape index: {}]   ;;  %s3342_s1 = inlined_call_operand.vmem [shape: f32[2,1,128], index: 1, kind: input, shape index: {}]   ;;  %s3343_s2 = inlined_call_operand.hbm [shape: f32[2,128,128], index: 2, kind: input, shape index: {}]   ;;  %s3344_s3 = inlined_call_operand.hbm [shape: f32[256,512], index: 3, kind: input, shape index: {}]   ;;  %s3345_s4 = inlined_call_operand.hbm [shape: f32[2,4,128,128], index: 4, kind: output, shape index: {}]  }
   0x1   :  { %3350 = sst [smem:[#allocation15_spill]] %s3341_s0 }
   0x2   :  { %3351 = sst [smem:[#allocation16_spill]] %s3344_s3 }
   0x3   :  { %9 = vsyncpa [#allocation3], 0 }
   0x4   :  { %11 = vsyncpa [#allocation3 + $0x1], 0 }
   0x5   :  { %12 = vsyncpa [#allocation6], 0 }
   0x6   :  { %14 = vsyncpa [#allocation6 + $0x1], 0 }
   0x7   :  { %15 = vsyncpa [#allocation4], 0 }
   0x8   :  { %17 = vsyncpa [#allocation4 + $0x1], 0  ;;  %s2672_s15 = smov 0   ;;  %s2674_s16 = smov 0  }
   0x9   :  { %s2676_s17 = smov 0   ;;  %s2678_s18 = smov 0  }
   0xa   :  { %s2680_s19 = smov 0   ;;  %s2682_s20 = smov 0  }
   0xb LB: > { %s2703_s21 = sadd.s32 4294967295, %s2632_s20   ;;  %s1687_s22 = sadd.s32 4294967294, %s2632_s20   ;;  %s2632_s20 = sphi %s2682_s20, %s23_s20   ;;  %s2628_s19 = sphi %s2680_s19, %s3377_s19   ;;  %s2624_s18 = sphi %s2678_s18, %s3376_s18   ;;  %s2620_s17 = sphi %s2676_s17, %s3375_s17   ;;  %s2616_s16 = sphi %s2674_s16, %s3374_s16   ;;  %s2612_s15 = sphi %s2672_s15, %s3373_s15  }
   0xc   : > { %p57_p0 = scmp.ne.s32.totalorder %s2616_s16, %s2612_s15  ;;  %p3346_p1 = scmp.eq.s32.totalorder %s2703_s21, 0 }
   0xd   : > { %p162_p3 = scmp.eq.s32.totalorder %s1687_s22, 1  ;;  %p1688_p5 = scmp.ge.s32.totalorder %s2632_s20, 1 }
   0xe   : > { %p2712_p4 = por %p3346_p1, %p57_p0  ;;  %p169_p7 = scmp.lt.s32.totalorder %s2632_s20, 3 }
   0xf   : > { %p2717_p6 = por %p162_p3, %p57_p0  ;;  %s2634_s26 = smov [#allocation7]  }
  0x10   : > { %s3352_s23 = scalar_select %p2712_p4, 1, 0 }
  0x11   : > { %s3353_s24 = scalar_select %p2717_p6, 1, 0 }
  0x12   : > { %p2722_p8 = pnand %p1688_p5, %p169_p7  ;;  %s181_s27 = sshll.u32 %s2634_s26, 4  ;;  %s182_s27 = int_to_ptr.vmem [resolvable:$true] %s181_s27 }
  0x13   : > { %s35_s29 = sadd.s32 1, %s2628_s19  ;;  %s3356_s3 = sld [smem:[#allocation16_spill]] }
  0x14   : > { %s3354_s25 = scalar_select %p2722_p8, 1, 0 }
  0x15   : > { %p2377_p9 = pneg %p2722_p8 }
  0x17   : > { %p2731_p11 = pnand %p2377_p9, %p3346_p1 }
  0x19   : > { %s2454_s6 = scalar_lea.hbm %s3356_s3, 16384  ;;  %p2456_p13 = pneg %p2731_p11 }
  0x1a   : > { %p2455_p12 = scmp.ne.s32.totalorder %s3356_s3, %s2454_s6  ;;  %p2461_p5 = scmp.lt.u32.totalorder %s2454_s6, %s3356_s3 }
  0x1c   : > { %p2457_p0 = pnand %p2456_p13, %p2455_p12 }
  0x1e   : > { %p2458_p3 = pneg %p2457_p0 }
  0x20   : > { %p2463_p7 = pnand %p2461_p5, %p2458_p3 }
  0x22   : > { %2466 = shalt.err (!%p2463_p7)
}
  0x23   : > { %s2467_s11 = scalar_lea.vmem %s182_s27, 16384  ;;  %p2475_p2 = scmp.lt.s32.totalorder %s182_s27, %s182_s27 }
  0x24   : > { %p2468_p9 = scmp.ne.s32.totalorder %s182_s27, %s2467_s11  ;;  %p2476_p6 = scmp.lt.s32.totalorder %s2467_s11, %s2467_s11 }
  0x26   : > { %p2470_p10 = pnand %p2468_p9, %p2456_p13  ;;  %p2477_p4 = por %p2476_p6, %p2475_p2 }
  0x28   : > { %p2471_p1 = pneg %p2470_p10 }
  0x2a   : > { %p2478_p8 = pnand %p2477_p4, %p2471_p1 }
  0x2c   : > { %2481 = shalt.err (!%p2478_p8)
}
  0x2d   : > { %s2635_s12 = smov 512   ;;  %s2636_s13 = smov 32  }
  0x2e   : > { %2380 = dma.hbm_to_vmem [thread:$0]  (!%p2731_p11), %s3356_s3, 16384, %s182_s27, [#allocation6], %s2635_s12, %s2635_s12, %s2636_s13  }
  0x2f   : > { %p37_p1 = scmp.ge.s32.totalorder %s35_s29, 2  ;;  %s44_s26 = sadd.s32 1, %s2620_s17 }
  0x30   : > { %p51_p2 = scmp.ne.s32.totalorder %s2620_s17, %s2616_s16  ;;  %p52_p4 = scmp.eq.s32.totalorder %s2632_s20, 0 }
  0x31   : > { %s3379_s29 = smov (%p37_p1, %s35_s29), 0  ;;  %p3359_p8 = scmp.eq.s32.totalorder %s2703_s21, 1 }
  0x32   : > { %3357 = sst [smem:[#allocation13_spill]] %s3379_s29  ;;  %p2758_p6 = por %p52_p4, %p51_p2 }
  0x33   : > { %p2764_p10 = por %p3359_p8, %p51_p2  ;;  %s39_s5 = ssub.s32 %s2628_s19, %s3379_s29 }
  0x34   : > { %p2393_p11 = scmp.lt.s32.totalorder %s2632_s20, 2  ;;  %p42_p12 = scmp.eq.s32.totalorder %s39_s5, 0 }
  0x35   : > { %s2772_s27 = sand.u32 1, %s2620_s17   ;;  %s1756_s8 = sshll.u32 %s2628_s19, 12 }
  0x36   : > { %s1691_s6 = sshll.u32 %s2772_s27, 8  ;;  %s3362_s0 = sld [smem:[#allocation15_spill]] }
  0x37   : > { %s2776_s7 = scalar_select %p42_p12, %s2620_s17, %s44_s26  }
  0x38   : > { %s199_s12 = scalar_lea.vmem [#allocation2], %s1691_s6  ;;  %p2788_p13 = pnand %p2393_p11, %p2758_p6 }
  0x39   : > { %3361 = sst [smem:[#allocation14_spill]] %s2776_s7  ;;  %s209_s13 = sshll.u32 %s199_s12, 4  ;;  %s2784_s13 = int_to_ptr.vmem [resolvable:$true] %s209_s13 }
  0x3a   : > { %s196_s26 = scalar_lea.sflag [#allocation3], %s2772_s27  ;;  %p2484_p3 = pneg %p2788_p13 }
  0x3c   : > { %s2782_s11 = scalar_lea.hbm %s3362_s0, %s1756_s8  ;;  %s2487_s30 = scalar_lea.hbm %s3362_s0, 8192 }
  0x3d   : > { %s2482_s5 = scalar_lea.hbm %s2782_s11, 4096  ;;  %p2488_p9 = scmp.lt.u32.totalorder %s2782_s11, %s3362_s0 }
  0x3e   : > { %p2483_p0 = scmp.ne.s32.totalorder %s2782_s11, %s2482_s5  ;;  %p2489_p1 = scmp.lt.u32.totalorder %s2487_s30, %s2482_s5 }
  0x3f   : > { %p2491_p4 = scmp.lt.u32.totalorder %s2482_s5, %s2782_s11 }
  0x40   : > { %p2485_p5 = pnand %p2484_p3, %p2483_p0  ;;  %p2490_p2 = por %p2489_p1, %p2488_p9 }
  0x42   : > { %p2486_p7 = pneg %p2485_p5  ;;  %p2492_p6 = por %p2491_p4, %p2490_p2 }
  0x44   : > { %p2493_p8 = pnand %p2492_p6, %p2486_p7 }
  0x46   : > { %2496 = shalt.err (!%p2493_p8)
}
  0x47   : > { %s2497_s12 = scalar_lea.vmem %s2784_s13, 4096  ;;  %s2637_s6 = smov [#allocation2]  }
  0x48   : > { %p2498_p11 = scmp.ne.s32.totalorder %s2784_s13, %s2497_s12  ;;  %s2502_s8 = sshll.u32 %s2637_s6, 4  ;;  %s2503_s8 = int_to_ptr.vmem [resolvable:$false] %s2502_s8 }
  0x49   : > { %s2504_s9 = scalar_lea.vmem %s2503_s8, 8192  ;;  %p2505_p5 = scmp.lt.s32.totalorder %s2784_s13, %s2503_s8 }
  0x4a   : > { %p2500_p12 = pnand %p2498_p11, %p2484_p3  ;;  %p2506_p9 = scmp.lt.s32.totalorder %s2504_s9, %s2497_s12 }
  0x4c   : > { %p2501_p0 = pneg %p2500_p12  ;;  %p2507_p1 = por %p2506_p9, %p2505_p5 }
  0x4e   : > { %p2508_p2 = pnand %p2507_p1, %p2501_p0 }
  0x50   : > { %2511 = shalt.err (!%p2508_p2)
}
  0x51   : > { %s2638_s5 = smov 256   ;;  %s2639_s30 = smov 16  }
  0x52   : > { %2384 = dma.hbm_to_vmem [thread:$0]  (!%p2788_p13), %s2782_s11, 4096, %s2784_s13, %s196_s26, %s2638_s5, %s2638_s5, %s2639_s30  }
  0x53   : > { %s1694_s10 = sshll.u32 %s2772_s27, 7  ;;  %s1757_s6 = sshll.u32 %s2628_s19, 11 }
  0x54   : > { %s2826_s9 = scalar_lea.hbm %s3343_s2, %s1757_s6  ;;  %s229_s22 = scalar_lea.vmem [#allocation5], %s1694_s10 }
  0x55   : > { %s236_s0 = sshll.u32 %s229_s22, 4  ;;  %s3364_s3 = sand.u32 1, %s2632_s20   ;;  %s2828_s0 = int_to_ptr.vmem [resolvable:$true] %s236_s0 }
  0x56   : > { %s2832_s29 = scalar_lea.sflag [#allocation6], %s3364_s3  ;;  %s2512_s7 = scalar_lea.hbm %s2826_s9, 2048 }
  0x57   : > { %p2513_p7 = scmp.ne.s32.totalorder %s2826_s9, %s2512_s7  ;;  %s2517_s13 = scalar_lea.hbm %s3343_s2, 4096 }
  0x58   : > { %p2518_p8 = scmp.lt.u32.totalorder %s2826_s9, %s3343_s2  ;;  %p2519_p11 = scmp.lt.u32.totalorder %s2517_s13, %s2512_s7 }
  0x59   : > { %p2515_p4 = pnand %p2513_p7, %p2484_p3  ;;  %p2521_p0 = scmp.lt.u32.totalorder %s2512_s7, %s2826_s9 }
  0x5a   : > { %p2520_p12 = por %p2519_p11, %p2518_p8 }
  0x5b   : > { %p2516_p6 = pneg %p2515_p4 }
  0x5c   : > { %p2522_p5 = por %p2521_p0, %p2520_p12 }
  0x5e   : > { %p2523_p9 = pnand %p2522_p5, %p2516_p6 }
  0x60   : > { %2526 = shalt.err (!%p2523_p9)
}
  0x61   : > { %s2527_s3 = scalar_lea.vmem %s2828_s0, 2048  ;;  %s2640_s22 = smov [#allocation5]  }
  0x62   : > { %p2528_p1 = scmp.ne.s32.totalorder %s2828_s0, %s2527_s3  ;;  %s2532_s30 = sshll.u32 %s2640_s22, 4  ;;  %s2533_s30 = int_to_ptr.vmem [resolvable:$false] %s2532_s30 }
  0x63   : > { %s2534_s10 = scalar_lea.vmem %s2533_s30, 4096  ;;  %p2535_p4 = scmp.lt.s32.totalorder %s2828_s0, %s2533_s30 }
  0x64   : > { %p2530_p2 = pnand %p2528_p1, %p2484_p3  ;;  %p2536_p8 = scmp.lt.s32.totalorder %s2534_s10, %s2527_s3 }
  0x66   : > { %p2531_p7 = pneg %p2530_p2  ;;  %p2537_p11 = por %p2536_p8, %p2535_p4 }
  0x68   : > { %p2538_p12 = pnand %p2537_p11, %p2531_p7 }
  0x6a   : > { %2541 = shalt.err (!%p2538_p12)
}
  0x6b   : > { %s2641_s7 = smov 128   ;;  %s2642_s6 = smov 8  }
  0x6c   : > { %2387 = dma.hbm_to_vmem [thread:$0]  (!%p2788_p13), %s2826_s9, 2048, %s2828_s0, %s2832_s29, %s2641_s7, %s2641_s7, %s2642_s6  }
  0x6d   : > { %p3365_p3 = scmp.ne.s32.totalorder %s3354_s25, 0 }
  0x6e   : > { %s2861_s8 = sand.u32 (!%p3365_p3), 1, %s2616_s16   ;;  %p3366_p6 = scmp.ne.s32.totalorder (!%p3365_p3), %s3352_s23, 0 }
  0x6f   : > { %248 = sbr.rel (%p3365_p3) target bundleno = 728 (0x2d8), region = 36  ;;  %s1698_s12 = sshll.u32 (!%p3365_p3), %s2861_s8, 8 }
  0x70   : > { %s251_s27 = scalar_lea.sflag (!%p3365_p3), [#allocation3], %s2861_s8  ;;  %s2865_s11 = scalar_lea.vmem (!%p3365_p3), [#allocation2], %s1698_s12 }
  0x76   : > { %2595 = dma.done.wait (%p3366_p6), %s251_s27, 4096  }
  0x77   : > { %2597 = vsyncadd (%p3366_p6), %s251_s27, 4294963200  ;;  %s259_s0 = sand.u32 1, %s2703_s21   ;;  %s1699_s25 = sshll.u32 %s2861_s8, 7 }
  0x78   : > { %s260_s29 = scalar_lea.sflag [#allocation6], %s259_s0  ;;  %s2873_s14 = scalar_lea.vmem [#allocation5], %s1699_s25 }
  0x79   : > { %2599 = dma.done.wait (%p3366_p6), %s260_s29, 2048  }
  0x7a   : > { %2601 = vsyncadd (%p3366_p6), %s260_s29, 4294965248  ;;  %p3367_p13 = scmp.eq.s32.totalorder %s2703_s21, 0 }
  0x7c   : > { %2603 = dma.done.wait (%p3367_p13), [#allocation6], 16384   ;;  %p3368_p0 = pmov %p3367_p13 }
  0x7d   : > { %v338_v0 = vld [vmem:[#allocation7 + $0x8] sm:$0xff]  ;;  %v337_v2 = vld [vmem:[#allocation7] sm:$0xff]  ;;  %v340_v25 = vld [vmem:[#allocation7 + $0x18] sm:$0xff]  ;;  %p301_p5 = scmp.lt.s32.totalorder %s2624_s18, 1  ;;  %s1701_s26 = sshll.u32 %s2861_s8, 9 }
  0x7e   : > { %2605 = vsyncadd (%p3368_p0), [#allocation6], 4294950912  ;;  %v342_v1 = vld [vmem:[#allocation7 + $0x28] sm:$0xff]  ;;  %v341_v4 = vld [vmem:[#allocation7 + $0x20] sm:$0xff]  ;;  %s3079_s5 = scalar_lea.vmem [#allocation8], %s1701_s26  ;;  %s1758_s3 = sshll.u32 %s2624_s18, 13 }
  0x7f   : > { %v2111_v3 = vpack.c.bf16 %v342_v1, %v338_v0  ;;  %v346_v5 = vld [vmem:[#allocation7 + $0x48] sm:$0xff]  ;;  %v2113_v7 = vpack.c.bf16 %v341_v4, %v337_v2  ;;  %v345_v9 = vld [vmem:[#allocation7 + $0x40] sm:$0xff]  ;;  %v344_v26 = vld [vmem:[#allocation7 + $0x38] sm:$0xff]  ;;  %s302_s21 = scalar_select %p301_p5, %s2624_s18, 1 }
  0x80   : > { %v350_v6 = vld [vmem:[#allocation7 + $0x68] sm:$0xff]  ;;  %v349_v10 = vld [vmem:[#allocation7 + $0x60] sm:$0xff]  ;;  %v2175_v29 = vpack.c.bf16 %v344_v26, %v340_v25  ;;  %v339_v30 = vld [vmem:[#allocation7 + $0x10] sm:$0xff]  ;;  %s1558_s22 = sshll.u32 %s3079_s5, 4  ;;  %s3285_s10 = scalar_lea.hbm %s3345_s4, %s1758_s3  ;;  %s3287_s22 = int_to_ptr.vmem [resolvable:$true] %s1558_s22 }
  0x81   : > { %v2115_v8 = vpack.c.bf16 %v350_v6, %v346_v5  ;;  %v354_v11 = vld [vmem:[#allocation7 + $0x88] sm:$0xff]  ;;  %2112 = vmatprep.subr.bf16.mxu0 %v2111_v3  ;;  %v2117_v13 = vpack.c.bf16 %v349_v10, %v345_v9  ;;  %v353_v15 = vld [vmem:[#allocation7 + $0x80] sm:$0xff]  ;;  %v343_v31 = vld [vmem:[#allocation7 + $0x30] sm:$0xff]  ;;  %s303_s13 = scalar_lea.vmem %s3342_s1, %s302_s21  ;;  %s1543_s7 = scalar_lea.sflag [#allocation4], %s2861_s8 }
  0x82   : > { %v358_v12 = vld [vmem:[#allocation7 + $0xa8] sm:$0xff]  ;;  %2114 = vmatpush1.bf16.msra.mxu0 %v2113_v7  ;;  %v357_v16 = vld [vmem:[#allocation7 + $0xa0] sm:$0xff]  ;;  %v2177_v34 = vpack.c.bf16 %v343_v31, %v339_v30  ;;  %v348_v35 = vld [vmem:[#allocation7 + $0x58] sm:$0xff]  ;;  %2176 = vmatprep.subr.bf16.mxu1 %v2175_v29  ;;  %s2542_s6 = scalar_lea.vmem %s3287_s22, 8192  ;;  %s2644_s12 = smov [#allocation8]  }
  0x83   : > { %2116 = vmatprep.subr.bf16.mxu0 %v2115_v8  ;;  %v2119_v14 = vpack.c.bf16 %v358_v12, %v354_v11  ;;  %v362_v17 = vld [vmem:[#allocation7 + $0xc8] sm:$0xff]  ;;  %v2121_v19 = vpack.c.bf16 %v357_v16, %v353_v15  ;;  %v361_v21 = vld [vmem:[#allocation7 + $0xc0] sm:$0xff]  ;;  %v352_v36 = vld [vmem:[#allocation7 + $0x78] sm:$0xff]  ;;  %p2543_p9 = scmp.ne.s32.totalorder %s3287_s22, %s2542_s6  ;;  %s2546_s27 = sshll.u32 %s2644_s12, 4  ;;  %s2547_s27 = int_to_ptr.vmem [resolvable:$false] %s2546_s27 }
  0x84   : > { %v366_v18 = vld [vmem:[#allocation7 + $0xe8] sm:$0xff]  ;;  %v365_v22 = vld [vmem:[#allocation7 + $0xe0] sm:$0xff]  ;;  %v2179_v39 = vpack.c.bf16 %v352_v36, %v348_v35  ;;  %v347_v40 = vld [vmem:[#allocation7 + $0x50] sm:$0xff]  ;;  %2178 = vmatpush1.bf16.msra.mxu1 %v2177_v34  ;;  %p2549_p7 = scmp.lt.s32.totalorder %s3287_s22, %s2547_s27 }
  0x85   : > { %v2123_v20 = vpack.c.bf16 %v366_v18, %v362_v17  ;;  %v370_v23 = vld [vmem:[#allocation7 + $0x108] sm:$0xff]  ;;  %v2125_v27 = vpack.c.bf16 %v365_v22, %v361_v21  ;;  %v369_v28 = vld [vmem:[#allocation7 + $0x100] sm:$0xff]  ;;  %v351_v41 = vld [vmem:[#allocation7 + $0x70] sm:$0xff]  ;;  %p2544_p1 = pnand %p2543_p9, %p2764_p10 }
  0x86   : > { %2118 = vmatpush1.bf16.msra.mxu0 %v2117_v13  ;;  %v374_v24 = vld [vmem:[#allocation7 + $0x128] sm:$0xff]  ;;  %v373_v33 = vld [vmem:[#allocation7 + $0x120] sm:$0xff]  ;;  %2180 = vmatprep.subr.bf16.mxu1 %v2179_v39  ;;  %v2181_v44 = vpack.c.bf16 %v351_v41, %v347_v40  ;;  %v356_v45 = vld [vmem:[#allocation7 + $0x98] sm:$0xff] }
  0x87   : > { %2120 = vmatprep.subr.bf16.mxu0 %v2119_v14  ;;  %v2127_v32 = vpack.c.bf16 %v374_v24, %v370_v23  ;;  %v378_v37 = vld [vmem:[#allocation7 + $0x148] sm:$0xff]  ;;  %v2129_v42 = vpack.c.bf16 %v373_v33, %v369_v28  ;;  %v377_v43 = vld [vmem:[#allocation7 + $0x140] sm:$0xff]  ;;  %v360_v46 = vld [vmem:[#allocation7 + $0xb8] sm:$0xff]  ;;  %p2545_p2 = pneg %p2544_p1 }
  0x88   : > { %v382_v38 = vld [vmem:[#allocation7 + $0x168] sm:$0xff]  ;;  %v381_v48 = vld [vmem:[#allocation7 + $0x160] sm:$0xff]  ;;  %v2183_v49 = vpack.c.bf16 %v360_v46, %v356_v45  ;;  %v355_v50 = vld [vmem:[#allocation7 + $0x90] sm:$0xff]  ;;  %2182 = vmatpush1.bf16.msra.mxu1 %v2181_v44 }
  0x89   : > { %v2131_v47 = vpack.c.bf16 %v382_v38, %v378_v37  ;;  %v359_v51 = vld [vmem:[#allocation7 + $0xb0] sm:$0xff]  ;;  %v386_v52 = vld [vmem:[#allocation7 + $0x188] sm:$0xff]  ;;  %v364_v54 = vld [vmem:[#allocation7 + $0xd8] sm:$0xff]  ;;  %v2133_v57 = vpack.c.bf16 %v381_v48, %v377_v43 }
  0x8a   : > { %2122 = vmatpush1.bf16.msra.mxu0 %v2121_v19  ;;  %v390_v53 = vld [vmem:[#allocation7 + $0x1a8] sm:$0xff]  ;;  %v2185_v55 = vpack.c.bf16 %v359_v51, %v355_v50  ;;  %v368_v56 = vld [vmem:[#allocation7 + $0xf8] sm:$0xff]  ;;  %v385_v58 = vld [vmem:[#allocation7 + $0x180] sm:$0xff]  ;;  %2184 = vmatprep.subr.bf16.mxu1 %v2183_v49 }
  0x8b   : > { %2124 = vmatprep.subr.bf16.mxu0 %v2123_v20  ;;  %v2187_v59 = vpack.c.bf16 %v368_v56, %v364_v54  ;;  %v363_v60 = vld [vmem:[#allocation7 + $0xd0] sm:$0xff]  ;;  %v2135_v62 = vpack.c.bf16 %v390_v53, %v386_v52  ;;  %v389_v63 = vld [vmem:[#allocation7 + $0x1a0] sm:$0xff]  ;;  %v372_v0 = vld [vmem:[#allocation7 + $0x118] sm:$0xff] }
  0x8c   : > { %v367_v61 = vld [vmem:[#allocation7 + $0xf0] sm:$0xff]  ;;  %v376_v1 = vld [vmem:[#allocation7 + $0x138] sm:$0xff]  ;;  %v394_v2 = vld [vmem:[#allocation7 + $0x1c8] sm:$0xff]  ;;  %2186 = vmatpush1.bf16.msra.mxu1 %v2185_v55  ;;  %v2137_v5 = vpack.c.bf16 %v389_v63, %v385_v58 }
  0x8d   : > { %v398_v3 = vld [vmem:[#allocation7 + $0x1e8] sm:$0xff]  ;;  %v2189_v4 = vpack.c.bf16 %v367_v61, %v363_v60  ;;  %v393_v6 = vld [vmem:[#allocation7 + $0x1c0] sm:$0xff]  ;;  %2188 = vmatprep.subr.bf16.mxu1 %v2187_v59  ;;  %v2191_v7 = vpack.c.bf16 %v376_v1, %v372_v0  ;;  %v371_v8 = vld [vmem:[#allocation7 + $0x110] sm:$0xff] }
  0x8e   : > { %2126 = vmatpush1.bf16.msra.mxu0 %v2125_v27  ;;  %v375_v9 = vld [vmem:[#allocation7 + $0x130] sm:$0xff]  ;;  %v2139_v10 = vpack.c.bf16 %v398_v3, %v394_v2  ;;  %v397_v11 = vld [vmem:[#allocation7 + $0x1e0] sm:$0xff]  ;;  %v380_v12 = vld [vmem:[#allocation7 + $0x158] sm:$0xff] }
  0x8f   : > { %2128 = vmatprep.subr.bf16.mxu0 %v2127_v32  ;;  %v384_v13 = vld [vmem:[#allocation7 + $0x178] sm:$0xff]  ;;  %v402_v14 = vld [vmem:[#allocation7 + $0x208] sm:$0xff]  ;;  %v2193_v16 = vpack.c.bf16 %v375_v9, %v371_v8  ;;  %v2141_v17 = vpack.c.bf16 %v397_v11, %v393_v6  ;;  %v401_v18 = vld [vmem:[#allocation7 + $0x200] sm:$0xff] }
  0x90   : > { %v406_v15 = vld [vmem:[#allocation7 + $0x228] sm:$0xff]  ;;  %2190 = vmatpush1.bf16.msra.mxu1 %v2189_v4  ;;  %v2195_v19 = vpack.c.bf16 %v384_v13, %v380_v12  ;;  %v379_v20 = vld [vmem:[#allocation7 + $0x150] sm:$0xff]  ;;  %v405_v23 = vld [vmem:[#allocation7 + $0x220] sm:$0xff] }
  0x91   : > { %2192 = vmatprep.subr.bf16.mxu1 %v2191_v7  ;;  %v383_v21 = vld [vmem:[#allocation7 + $0x170] sm:$0xff]  ;;  %v2143_v22 = vpack.c.bf16 %v406_v15, %v402_v14  ;;  %v388_v24 = vld [vmem:[#allocation7 + $0x198] sm:$0xff]  ;;  %v410_v26 = vld [vmem:[#allocation7 + $0x248] sm:$0xff]  ;;  %v2145_v30 = vpack.c.bf16 %v405_v23, %v401_v18 }
  0x92   : > { %2130 = vmatpush1.bf16.msra.mxu0 %v2129_v42  ;;  %v392_v25 = vld [vmem:[#allocation7 + $0x1b8] sm:$0xff]  ;;  %v414_v27 = vld [vmem:[#allocation7 + $0x268] sm:$0xff]  ;;  %v409_v28 = vld [vmem:[#allocation7 + $0x240] sm:$0xff]  ;;  %v2197_v29 = vpack.c.bf16 %v383_v21, %v379_v20 }
  0x93   : > { %2132 = vmatprep.subr.bf16.mxu0 %v2131_v47  ;;  %v2199_v31 = vpack.c.bf16 %v392_v25, %v388_v24  ;;  %v387_v32 = vld [vmem:[#allocation7 + $0x190] sm:$0xff]  ;;  %v306_v34 = vld [vmem:[%s2865_s11 + $0x8] sm:$0xff]  ;;  %v2147_v35 = vpack.c.bf16 %v414_v27, %v410_v26  ;;  %v413_v36 = vld [vmem:[#allocation7 + $0x260] sm:$0xff] }
  0x94   : > { %2194 = vmatpush1.bf16.msra.mxu1 %v2193_v16  ;;  %v391_v33 = vld [vmem:[#allocation7 + $0x1b0] sm:$0xff]  ;;  %v396_v37 = vld [vmem:[#allocation7 + $0x1d8] sm:$0xff]  ;;  %529 = vmatprep.mubr.f32.mxu0 %v306_v34  ;;  %v418_v39 = vld [vmem:[#allocation7 + $0x288] sm:$0xff]  ;;  %v2149_v42 = vpack.c.bf16 %v413_v36, %v409_v28 }
  0x95   : > { %2196 = vmatprep.subr.bf16.mxu1 %v2195_v19  ;;  %v400_v38 = vld [vmem:[#allocation7 + $0x1f8] sm:$0xff]  ;;  %v422_v40 = vld [vmem:[#allocation7 + $0x2a8] sm:$0xff]  ;;  %690 = vmatprep.mubr.f32.mxu1 %v306_v34  ;;  %v2201_v41 = vpack.c.bf16 %v391_v33, %v387_v32  ;;  %v417_v43 = vld [vmem:[#allocation7 + $0x280] sm:$0xff] }
  0x96   : > { %2134 = vmatpush1.bf16.msra.mxu0 %v2133_v57  ;;  %v2203_v44 = vpack.c.bf16 %v400_v38, %v396_v37  ;;  %v395_v45 = vld [vmem:[#allocation7 + $0x1d0] sm:$0xff]  ;;  %v2151_v47 = vpack.c.bf16 %v422_v40, %v418_v39  ;;  %v421_v48 = vld [vmem:[#allocation7 + $0x2a0] sm:$0xff]  ;;  %v404_v49 = vld [vmem:[#allocation7 + $0x218] sm:$0xff] }
  0x97   : > { %2136 = vmatprep.subr.bf16.mxu0 %v2135_v62  ;;  %v399_v46 = vld [vmem:[#allocation7 + $0x1f0] sm:$0xff]  ;;  %v408_v50 = vld [vmem:[#allocation7 + $0x238] sm:$0xff]  ;;  %v426_v51 = vld [vmem:[#allocation7 + $0x2c8] sm:$0xff]  ;;  %v2153_v54 = vpack.c.bf16 %v421_v48, %v417_v43 }
  0x98   : > { %2198 = vmatpush1.bf16.msra.mxu1 %v2197_v29  ;;  %v430_v52 = vld [vmem:[#allocation7 + $0x2e8] sm:$0xff]  ;;  %v2205_v53 = vpack.c.bf16 %v399_v46, %v395_v45  ;;  %v425_v55 = vld [vmem:[#allocation7 + $0x2c0] sm:$0xff]  ;;  %v2207_v56 = vpack.c.bf16 %v408_v50, %v404_v49  ;;  %v403_v57 = vld [vmem:[#allocation7 + $0x210] sm:$0xff] }
  0x99   : > { %2200 = vmatprep.subr.bf16.mxu1 %v2199_v31  ;;  %v407_v58 = vld [vmem:[#allocation7 + $0x230] sm:$0xff]  ;;  %v2155_v59 = vpack.c.bf16 %v430_v52, %v426_v51  ;;  %v429_v60 = vld [vmem:[#allocation7 + $0x2e0] sm:$0xff]  ;;  %v412_v61 = vld [vmem:[#allocation7 + $0x258] sm:$0xff] }
  0x9a   : > { %2138 = vmatpush1.bf16.msra.mxu0 %v2137_v5  ;;  %v416_v62 = vld [vmem:[#allocation7 + $0x278] sm:$0xff]  ;;  %v434_v63 = vld [vmem:[#allocation7 + $0x308] sm:$0xff]  ;;  %v2209_v1 = vpack.c.bf16 %v407_v58, %v403_v57  ;;  %v2157_v2 = vpack.c.bf16 %v429_v60, %v425_v55  ;;  %v433_v3 = vld [vmem:[#allocation7 + $0x300] sm:$0xff] }
  0x9b   : > { %2140 = vmatprep.subr.bf16.mxu0 %v2139_v10  ;;  %v438_v0 = vld [vmem:[#allocation7 + $0x328] sm:$0xff]  ;;  %v2211_v4 = vpack.c.bf16 %v416_v62, %v412_v61  ;;  %v411_v5 = vld [vmem:[#allocation7 + $0x250] sm:$0xff]  ;;  %v437_v8 = vld [vmem:[#allocation7 + $0x320] sm:$0xff] }
  0x9c   : > { %2202 = vmatpush1.bf16.msra.mxu1 %v2201_v41  ;;  %v415_v6 = vld [vmem:[#allocation7 + $0x270] sm:$0xff]  ;;  %v2159_v7 = vpack.c.bf16 %v438_v0, %v434_v63  ;;  %v420_v9 = vld [vmem:[#allocation7 + $0x298] sm:$0xff]  ;;  %v442_v11 = vld [vmem:[#allocation7 + $0x348] sm:$0xff]  ;;  %v2161_v14 = vpack.c.bf16 %v437_v8, %v433_v3 }
  0x9d   : > { %2204 = vmatprep.subr.bf16.mxu1 %v2203_v44  ;;  %v424_v10 = vld [vmem:[#allocation7 + $0x2b8] sm:$0xff]  ;;  %v446_v12 = vld [vmem:[#allocation7 + $0x368] sm:$0xff]  ;;  %v2213_v13 = vpack.c.bf16 %v415_v6, %v411_v5  ;;  %v441_v15 = vld [vmem:[#allocation7 + $0x340] sm:$0xff] }
  0x9e   : > { %2142 = vmatpush1.bf16.msra.mxu0 %v2141_v17  ;;  %v2215_v16 = vpack.c.bf16 %v424_v10, %v420_v9  ;;  %v419_v17 = vld [vmem:[#allocation7 + $0x290] sm:$0xff]  ;;  %v2163_v19 = vpack.c.bf16 %v446_v12, %v442_v11  ;;  %v445_v20 = vld [vmem:[#allocation7 + $0x360] sm:$0xff]  ;;  %v428_v21 = vld [vmem:[#allocation7 + $0x2d8] sm:$0xff] }
  0x9f   : > { %2144 = vmatprep.subr.bf16.mxu0 %v2143_v22  ;;  %v423_v18 = vld [vmem:[#allocation7 + $0x2b0] sm:$0xff]  ;;  %v432_v22 = vld [vmem:[#allocation7 + $0x2f8] sm:$0xff]  ;;  %v450_v23 = vld [vmem:[#allocation7 + $0x388] sm:$0xff]  ;;  %v2165_v26 = vpack.c.bf16 %v445_v20, %v441_v15 }
  0xa0   : > { %2206 = vmatpush1.bf16.msra.mxu1 %v2205_v53  ;;  %v454_v24 = vld [vmem:[#allocation7 + $0x3a8] sm:$0xff]  ;;  %v2217_v25 = vpack.c.bf16 %v423_v18, %v419_v17  ;;  %v449_v27 = vld [vmem:[#allocation7 + $0x380] sm:$0xff]  ;;  %v2219_v28 = vpack.c.bf16 %v432_v22, %v428_v21  ;;  %v427_v29 = vld [vmem:[#allocation7 + $0x2d0] sm:$0xff] }
  0xa1   : > { %2208 = vmatprep.subr.bf16.mxu1 %v2207_v56  ;;  %v2167_v31 = vpack.c.bf16 %v454_v24, %v450_v23  ;;  %v453_v32 = vld [vmem:[#allocation7 + $0x3a0] sm:$0xff]  ;;  %v436_v33 = vld [vmem:[#allocation7 + $0x318] sm:$0xff]  ;;  %v462_v36 = vld [vmem:[#allocation7 + $0x3e8] sm:$0xff] }
  0xa2   : > { %2146 = vmatpush1.bf16.msra.mxu0 %v2145_v30  ;;  %v431_v30 = vld [vmem:[#allocation7 + $0x2f0] sm:$0xff]  ;;  %v440_v34 = vld [vmem:[#allocation7 + $0x338] sm:$0xff]  ;;  %v2169_v38 = vpack.c.bf16 %v453_v32, %v449_v27  ;;  %v457_v39 = vld [vmem:[#allocation7 + $0x3c0] sm:$0xff] }
  0xa3   : > { %2148 = vmatprep.subr.bf16.mxu0 %v2147_v35  ;;  %v458_v35 = vld [vmem:[#allocation7 + $0x3c8] sm:$0xff]  ;;  %v2221_v37 = vpack.c.bf16 %v431_v30, %v427_v29  ;;  %v2223_v40 = vpack.c.bf16 %v440_v34, %v436_v33  ;;  %v435_v41 = vld [vmem:[#allocation7 + $0x310] sm:$0xff]  ;;  %v461_v44 = vld [vmem:[#allocation7 + $0x3e0] sm:$0xff] }
  0xa4   : > { %2210 = vmatpush1.bf16.msra.mxu1 %v2209_v1  ;;  %v2171_v43 = vpack.c.bf16 %v462_v36, %v458_v35  ;;  %v444_v45 = vld [vmem:[#allocation7 + $0x358] sm:$0xff]  ;;  %v880_v48 = vld [vmem:[%s2873_s14 + $0x8] sm:$0xff]  ;;  %v2173_v50 = vpack.c.bf16 %v461_v44, %v457_v39  ;;  %v443_v52 = vld [vmem:[#allocation7 + $0x350] sm:$0xff] }
  0xa5   : > { %2212 = vmatprep.subr.bf16.mxu1 %v2211_v4  ;;  %v448_v46 = vld [vmem:[#allocation7 + $0x378] sm:$0xff]  ;;  %v447_v53 = vld [vmem:[#allocation7 + $0x370] sm:$0xff]  ;;  %v305_v60 = vld [vmem:[%s2865_s11] sm:$0xff] }
  0xa6   : > { %2150 = vmatpush1.bf16.msra.mxu0 %v2149_v42  ;;  %v439_v42 = vld [vmem:[#allocation7 + $0x330] sm:$0xff]  ;;  %v2227_v51 = vpack.c.bf16 %v448_v46, %v444_v45  ;;  %v456_v55 = vld [vmem:[#allocation7 + $0x3b8] sm:$0xff]  ;;  %v2229_v57 = vpack.c.bf16 %v447_v53, %v443_v52  ;;  %v883_v5 = vld [vmem:[%s2873_s14 + $0x20] sm:$0xff] }
  0xa7   : > { %2152 = vmatprep.subr.bf16.mxu0 %v2151_v47  ;;  %v879_v47 = vld [vmem:[%s2873_s14] sm:$0xff]  ;;  %v2225_v49 = vpack.c.bf16 %v439_v42, %v435_v41  ;;  %v881_v58 = vld [vmem:[%s2873_s14 + $0x10] sm:$0xff]  ;;  %v308_v0 = vld [vmem:[%s2865_s11 + $0x18] sm:$0xff] }
  0xa8   : > { %2214 = vmatpush1.bf16.msra.mxu1 %v2213_v13  ;;  %v2886_v56 = vpack.c.bf16 %v880_v48, %v879_v47  ;;  %v451_v62 = vld [vmem:[#allocation7 + $0x390] sm:$0xff]  ;;  %v460_v1 = vld [vmem:[#allocation7 + $0x3d8] sm:$0xff]  ;;  %v884_v6 = vld [vmem:[%s2873_s14 + $0x28] sm:$0xff] }
  0xa9   : > { %2216 = vmatprep.subr.bf16.mxu1 %v2215_v16  ;;  %v455_v63 = vld [vmem:[#allocation7 + $0x3b0] sm:$0xff]  ;;  %v310_v11 = vld [vmem:[%s2865_s11 + $0x28] sm:$0xff]  ;;  %v2901_v12 = vpack.c.bf16 %v884_v6, %v883_v5  ;;  %v886_v15 = vld [vmem:[%s2873_s14 + $0x38] sm:$0xff] }
  0xaa   : > { %2154 = vmatpush1.bf16.msra.mxu0 %v2153_v54  ;;  %v452_v54 = vld [vmem:[#allocation7 + $0x398] sm:$0xff]  ;;  %v2233_v4 = vpack.c.bf16 %v455_v63, %v451_v62  ;;  %v459_v9 = vld [vmem:[#allocation7 + $0x3d0] sm:$0xff]  ;;  %v309_v16 = vld [vmem:[%s2865_s11 + $0x20] sm:$0xff] }
  0xab   : > { %2156 = vmatprep.subr.bf16.mxu0 %v2155_v59  ;;  %v882_v59 = vld [vmem:[%s2873_s14 + $0x18] sm:$0xff]  ;;  %v2231_v61 = vpack.c.bf16 %v456_v55, %v452_v54  ;;  %v463_v10 = vld [vmem:[#allocation7 + $0x3f0] sm:$0xff]  ;;  %v888_v20 = vld [vmem:[%s2873_s14 + $0x48] sm:$0xff] }
  0xac   : > { %2218 = vmatpush1.bf16.msra.mxu1 %v2217_v25  ;;  %v2893_v3 = vpack.c.bf16 %v882_v59, %v881_v58  ;;  %v2237_v13 = vpack.c.bf16 %v463_v10, %v459_v9  ;;  %v312_v17 = vld [vmem:[%s2865_s11 + $0x38] sm:$0xff]  ;;  %v311_v21 = vld [vmem:[%s2865_s11 + $0x30] sm:$0xff]  ;;  %v314_v22 = vld [vmem:[%s2865_s11 + $0x48] sm:$0xff] }
  0xad   : > { %2220 = vmatprep.subr.bf16.mxu1 %v2219_v28  ;;  %v889_v24 = vld [vmem:[%s2873_s14 + $0x50] sm:$0xff]  ;;  %v890_v25 = vld [vmem:[%s2873_s14 + $0x58] sm:$0xff]  ;;  %v891_v29 = vld [vmem:[%s2873_s14 + $0x60] sm:$0xff] }
  0xae   : > { %2158 = vmatpush1.bf16.msra.mxu0 %v2157_v2  ;;  %v464_v2 = vld [vmem:[#allocation7 + $0x3f8] sm:$0xff]  ;;  %v2928_v28 = vpack.c.bf16 %v890_v25, %v889_v24  ;;  %v892_v30 = vld [vmem:[%s2873_s14 + $0x68] sm:$0xff]  ;;  %v317_v34 = vld [vmem:[%s2865_s11 + $0x60] sm:$0xff] }
  0xaf   : > { %2160 = vmatprep.subr.bf16.mxu0 %v2159_v7  ;;  %v307_v7 = vld [vmem:[%s2865_s11 + $0x10] sm:$0xff]  ;;  %v2235_v8 = vpack.c.bf16 %v464_v2, %v460_v1  ;;  %v316_v27 = vld [vmem:[%s2865_s11 + $0x58] sm:$0xff]  ;;  %v318_v32 = vld [vmem:[%s2865_s11 + $0x68] sm:$0xff]  ;;  %v2938_v33 = vpack.c.bf16 %v892_v30, %v891_v29 }
  0xb0   : > { %2222 = vmatpush1.bf16.msra.mxu1 %v2221_v37  ;;  %v320_v35 = vld [vmem:[%s2865_s11 + $0x78] sm:$0xff]  ;;  %v319_v36 = vld [vmem:[%s2865_s11 + $0x70] sm:$0xff]  ;;  %v322_v37 = vld [vmem:[%s2865_s11 + $0x88] sm:$0xff] }
  0xb1   : > { %2224 = vmatprep.subr.bf16.mxu1 %v2223_v40  ;;  %v324_v39 = vld [vmem:[%s2865_s11 + $0x98] sm:$0xff]  ;;  %v323_v40 = vld [vmem:[%s2865_s11 + $0x90] sm:$0xff]  ;;  %v326_v41 = vld [vmem:[%s2865_s11 + $0xa8] sm:$0xff] }
  0xb2   : > { %2162 = vmatpush1.bf16.msra.mxu0 %v2161_v14  ;;  %v885_v14 = vld [vmem:[%s2873_s14 + $0x30] sm:$0xff]  ;;  %v325_v42 = vld [vmem:[%s2865_s11 + $0xa0] sm:$0xff]  ;;  %v330_v45 = vld [vmem:[%s2865_s11 + $0xc8] sm:$0xff] }
  0xb3   : > { %2164 = vmatprep.subr.bf16.mxu0 %v2163_v19  ;;  %v2909_v18 = vpack.c.bf16 %v886_v15, %v885_v14  ;;  %v887_v19 = vld [vmem:[%s2873_s14 + $0x40] sm:$0xff]  ;;  %v327_v44 = vld [vmem:[%s2865_s11 + $0xb0] sm:$0xff]  ;;  %v332_v47 = vld [vmem:[%s2865_s11 + $0xd8] sm:$0xff] }
  0xb4   : > { %2226 = vmatpush1.bf16.msra.mxu1 %v2225_v49  ;;  %v2918_v23 = vpack.c.bf16 %v888_v20, %v887_v19  ;;  %v329_v46 = vld [vmem:[%s2865_s11 + $0xc0] sm:$0xff]  ;;  %v331_v48 = vld [vmem:[%s2865_s11 + $0xd0] sm:$0xff]  ;;  %v334_v49 = vld [vmem:[%s2865_s11 + $0xe8] sm:$0xff] }
  0xb5   : > { %2228 = vmatprep.subr.bf16.mxu1 %v2227_v51  ;;  %v336_v51 = vld [vmem:[%s2865_s11 + $0xf8] sm:$0xff]  ;;  %v335_v52 = vld [vmem:[%s2865_s11 + $0xf0] sm:$0xff] }
  0xb6   : > { %2166 = vmatpush1.bf16.msra.mxu0 %v2165_v26  ;;  %v313_v26 = vld [vmem:[%s2865_s11 + $0x40] sm:$0xff]  ;;  %v893_v53 = vld [vmem:[%s2873_s14 + $0x70] sm:$0xff]  ;;  %v894_v54 = vld [vmem:[%s2873_s14 + $0x78] sm:$0xff] }
  0xb7   : > { %2168 = vmatprep.subr.bf16.mxu0 %v2167_v31  ;;  %v315_v31 = vld [vmem:[%s2865_s11 + $0x50] sm:$0xff]  ;;  %v2973_v55 = vpack.c.bf16 %v894_v54, %v893_v53 }
  0xb8   : > { %2230 = vmatpush1.bf16.msra.mxu1 %v2229_v57 }
  0xb9   : > { %2232 = vmatprep.subr.bf16.mxu1 %v2231_v61 }
  0xba   : > { %2170 = vmatpush1.bf16.msra.mxu0 %v2169_v38  ;;  %v321_v38 = vld [vmem:[%s2865_s11 + $0x80] sm:$0xff] }
  0xbb   : > { %2172 = vmatprep.subr.bf16.mxu0 %v2171_v43  ;;  %v328_v43 = vld [vmem:[%s2865_s11 + $0xb8] sm:$0xff] }
  0xbc   : > { %2234 = vmatpush1.bf16.msra.mxu1 %v2233_v4 }
  0xbd   : > { %2236 = vmatprep.subr.bf16.mxu1 %v2235_v8 }
  0xbe   : > { %2174 = vmatpush1.bf16.msra.mxu0 %v2173_v50  ;;  %v333_v50 = vld [vmem:[%s2865_s11 + $0xe0] sm:$0xff]  ;;  %s2548_s11 = scalar_lea.vmem %s2547_s27, 16384 }
  0xbf   : > { %2240 = vmatprep.subr.bf16.mxu0 %v2886_v56  ;;  %p2550_p4 = scmp.lt.s32.totalorder %s2548_s11, %s2542_s6 }
  0xc0   : > { %2238 = vmatpush1.bf16.msra.mxu1 %v2237_v13 }
  0xc1   : > { %530 = vmatmul.mubr.f32.vlgmr.msra.gmra.mrb[0].mxu0 %v305_v60  ;;  %2272 = vmatprep.subr.bf16.mxu1 %v2886_v56  ;;  %p2551_p8 = por %p2550_p4, %p2549_p7 }
  0xc2   : > { %535 = vmatprep.mubr.f32.mxu0 %v308_v0  ;;  %2242 = vmatpush3.bf16.msra.mxu0 %v2886_v56 }
  0xc3   : > { %2244 = vmatprep.subr.bf16.mxu0 %v2893_v3  ;;  %691 = vmatmul.mubr.f32.vlgmr.msra.gmra.mrb[0].mxu1 %v305_v60  ;;  %p2552_p11 = pnand %p2551_p8, %p2545_p2 }
  0xc4   : > { %696 = vmatprep.mubr.f32.mxu1 %v308_v0  ;;  %2274 = vmatpush3.bf16.msra.mxu1 %v2886_v56 }
  0xc5   : > { %536 = vmatmul.mubr.f32.gmra.mrb[2].mxu0 %v307_v7  ;;  %2276 = vmatprep.subr.bf16.mxu1 %v2893_v3 }
  0xc6   : > { %541 = vmatprep.mubr.f32.mxu0 %v310_v11  ;;  %2246 = vmatpush3.bf16.msra.mxu0 %v2893_v3 }
  0xc7   : > { %2248 = vmatprep.subr.bf16.mxu0 %v2901_v12  ;;  %697 = vmatmul.mubr.f32.gmra.mrb[2].mxu1 %v307_v7 }
  0xc8   : > { %702 = vmatprep.mubr.f32.mxu1 %v310_v11  ;;  %2278 = vmatpush3.bf16.msra.mxu1 %v2893_v3 }
  0xc9   : > { %542 = vmatmul.mubr.f32.gmra.mrb[4].mxu0 %v309_v16  ;;  %2280 = vmatprep.subr.bf16.mxu1 %v2901_v12 }
  0xca   : > { %547 = vmatprep.mubr.f32.mxu0 %v312_v17  ;;  %2250 = vmatpush3.bf16.msra.mxu0 %v2901_v12 }
  0xcb   : > { %2252 = vmatprep.subr.bf16.mxu0 %v2909_v18  ;;  %703 = vmatmul.mubr.f32.gmra.mrb[4].mxu1 %v309_v16 }
  0xcc   : > { %708 = vmatprep.mubr.f32.mxu1 %v312_v17  ;;  %2282 = vmatpush3.bf16.msra.mxu1 %v2901_v12 }
  0xcd   : > { %548 = vmatmul.mubr.f32.gmra.mrb[6].mxu0 %v311_v21  ;;  %2284 = vmatprep.subr.bf16.mxu1 %v2909_v18 }
  0xce   : > { %553 = vmatprep.mubr.f32.mxu0 %v314_v22  ;;  %2254 = vmatpush3.bf16.msra.mxu0 %v2909_v18 }
  0xcf   : > { %2256 = vmatprep.subr.bf16.mxu0 %v2918_v23  ;;  %709 = vmatmul.mubr.f32.gmra.mrb[6].mxu1 %v311_v21 }
  0xd0   : > { %714 = vmatprep.mubr.f32.mxu1 %v314_v22  ;;  %2286 = vmatpush3.bf16.msra.mxu1 %v2909_v18 }
  0xd1   : > { %554 = vmatmul.mubr.f32.gmra.mrb[8].mxu0 %v313_v26  ;;  %2288 = vmatprep.subr.bf16.mxu1 %v2918_v23 }
  0xd2   : > { %559 = vmatprep.mubr.f32.mxu0 %v316_v27  ;;  %2258 = vmatpush3.bf16.msra.mxu0 %v2918_v23 }
  0xd3   : > { %2260 = vmatprep.subr.bf16.mxu0 %v2928_v28  ;;  %715 = vmatmul.mubr.f32.gmra.mrb[8].mxu1 %v313_v26 }
  0xd4   : > { %720 = vmatprep.mubr.f32.mxu1 %v316_v27  ;;  %2290 = vmatpush3.bf16.msra.mxu1 %v2918_v23 }
  0xd5   : > { %560 = vmatmul.mubr.f32.gmra.mrb[10].mxu0 %v315_v31  ;;  %2292 = vmatprep.subr.bf16.mxu1 %v2928_v28 }
  0xd6   : > { %565 = vmatprep.mubr.f32.mxu0 %v318_v32  ;;  %2262 = vmatpush3.bf16.msra.mxu0 %v2928_v28 }
  0xd7   : > { %2264 = vmatprep.subr.bf16.mxu0 %v2938_v33  ;;  %721 = vmatmul.mubr.f32.gmra.mrb[10].mxu1 %v315_v31 }
  0xd8   : > { %726 = vmatprep.mubr.f32.mxu1 %v318_v32  ;;  %2294 = vmatpush3.bf16.msra.mxu1 %v2928_v28 }
  0xd9   : > { %566 = vmatmul.mubr.f32.gmra.mrb[12].mxu0 %v317_v34  ;;  %2296 = vmatprep.subr.bf16.mxu1 %v2938_v33 }
  0xda   : > { %571 = vmatprep.mubr.f32.mxu0 %v320_v35  ;;  %2266 = vmatpush3.bf16.msra.mxu0 %v2938_v33 }
  0xdb   : > { %727 = vmatmul.mubr.f32.gmra.mrb[12].mxu1 %v317_v34  ;;  %2268 = vmatprep.subr.bf16.mxu0 %v2973_v55 }
  0xdc   : > { %732 = vmatprep.mubr.f32.mxu1 %v320_v35  ;;  %2298 = vmatpush3.bf16.msra.mxu1 %v2938_v33 }
  0xdd   : > { %572 = vmatmul.mubr.f32.gmra.mrb[14].mxu0 %v319_v36  ;;  %2300 = vmatprep.subr.bf16.mxu1 %v2973_v55 }
  0xde   : > { %577 = vmatprep.mubr.f32.mxu0 %v322_v37  ;;  %2270 = vmatpush3.bf16.msra.mxu0 %v2973_v55 }
  0xdf   : > { %733 = vmatmul.mubr.f32.gmra.mrb[14].mxu1 %v319_v36  ;;  %2304 = vmatprep.subr.bf16.mxu0 %v2886_v56 }
  0xe0   : > { %738 = vmatprep.mubr.f32.mxu1 %v322_v37  ;;  %2302 = vmatpush3.bf16.msra.mxu1 %v2973_v55 }
  0xe1   : > { %578 = vmatmul.mubr.f32.gmra.mrb[16].mxu0 %v321_v38  ;;  %2336 = vmatprep.subr.bf16.mxu1 %v2886_v56 }
  0xe2   : > { %583 = vmatprep.mubr.f32.mxu0 %v324_v39 }
  0xe3   : > { %739 = vmatmul.mubr.f32.gmra.mrb[16].mxu1 %v321_v38 }
  0xe4   : > { %744 = vmatprep.mubr.f32.mxu1 %v324_v39 }
  0xe5   : > { %584 = vmatmul.mubr.f32.gmra.mrb[18].mxu0 %v323_v40 }
  0xe6   : > { %589 = vmatprep.mubr.f32.mxu0 %v326_v41 }
  0xe7   : > { %745 = vmatmul.mubr.f32.gmra.mrb[18].mxu1 %v323_v40 }
  0xe8   : > { %750 = vmatprep.mubr.f32.mxu1 %v326_v41 }
  0xe9   : > { %590 = vmatmul.mubr.f32.gmra.mrb[20].mxu0 %v325_v42 }
  0xea   : > { %595 = vmatprep.mubr.f32.mxu0 %v328_v43 }
  0xeb   : > { %751 = vmatmul.mubr.f32.gmra.mrb[20].mxu1 %v325_v42 }
  0xec   : > { %756 = vmatprep.mubr.f32.mxu1 %v328_v43 }
  0xed   : > { %596 = vmatmul.mubr.f32.gmra.mrb[22].mxu0 %v327_v44 }
  0xee   : > { %601 = vmatprep.mubr.f32.mxu0 %v330_v45 }
  0xef   : > { %757 = vmatmul.mubr.f32.gmra.mrb[22].mxu1 %v327_v44 }
  0xf0   : > { %762 = vmatprep.mubr.f32.mxu1 %v330_v45 }
  0xf1   : > { %602 = vmatmul.mubr.f32.gmra.mrb[24].mxu0 %v329_v46 }
  0xf2   : > { %607 = vmatprep.mubr.f32.mxu0 %v332_v47 }
  0xf3   : > { %763 = vmatmul.mubr.f32.gmra.mrb[24].mxu1 %v329_v46 }
  0xf4   : > { %768 = vmatprep.mubr.f32.mxu1 %v332_v47 }
  0xf5   : > { %608 = vmatmul.mubr.f32.gmra.mrb[26].mxu0 %v331_v48 }
  0xf6   : > { %613 = vmatprep.mubr.f32.mxu0 %v334_v49 }
  0xf7   : > { %769 = vmatmul.mubr.f32.gmra.mrb[26].mxu1 %v331_v48 }
  0xf8   : > { %774 = vmatprep.mubr.f32.mxu1 %v334_v49 }
  0xf9   : > { %614 = vmatmul.mubr.f32.gmra.mrb[28].mxu0 %v333_v50 }
  0xfa   : > { %619 = vmatprep.mubr.f32.mxu0 %v336_v51 }
  0xfb   : > { %775 = vmatmul.mubr.f32.gmra.mrb[28].mxu1 %v333_v50 }
  0xfc   : > { %780 = vmatprep.mubr.f32.mxu1 %v336_v51 }
  0xfd   : > { %620 = vmatmul.mubr.f32.gmra.mrb[30].mxu0 %v335_v52 }
  0xff   : > { %781 = vmatmul.mubr.f32.gmra.mrb[30].mxu1 %v335_v52 }
 0x194   : > { %v531_v57 = vpop.f32.mrb[0].mxu0 }
 0x195   : > { %v533_v58 = vpop.f32.mrb[1].mxu0  ;;  %1919 = vmatprep.mubr.f32.mxu0 %v531_v57  ;;  %v788_v57 = vlaneseq }
 0x196   : > { %1975 = vmatprep.mubr.f32.mxu1 %v533_v58  ;;  %v2986_v63 = vpop.f32.mrb[0].mxu1 }
 0x197   : > { %v2990_v1 = vpop.f32.mrb[1].mxu1  ;;  %v3048_v58 = vshrl.u32 %v788_v57, 7 }
 0x198   : > { %v537_v59 = vpop.f32.mrb[2].mxu0 }
 0x199   : > { %v539_v60 = vpop.f32.mrb[3].mxu0  ;;  %1920 = vmatmul.mubr.f32.vlgmr.msra.gmra.mrb[32].mxu0 %v537_v59  ;;  %v790_v59 = vadd.s32 8, %v3048_v58 }
 0x19a   : > { %1976 = vmatmul.mubr.f32.vlgmr.msra.gmra.mrb[32].mxu1 %v539_v60  ;;  %2306 = vmatpush3.bf16.msra.mxu0 %v2886_v56  ;;  %v2994_v2 = vpop.f32.mrb[2].mxu1  ;;  %v3052_v60 = vand.u32 127, %v788_v57  ;;  %v800_v57 = vadd.s32 88, %v3048_v58 }
 0x19b   : > { %2338 = vmatpush3.bf16.msra.mxu1 %v2886_v56  ;;  %2308 = vmatprep.subr.bf16.mxu0 %v2893_v3 }
 0x19c   : > { %v543_v61 = vpop.f32.mrb[4].mxu0  ;;  %2340 = vmatprep.subr.bf16.mxu1 %v2893_v3  ;;  %vm826_vm0 = vcmp.gt.s32.totalorder %v790_v59, %v3052_v60  ;;  %vm825_vm1 = vcmp.gt.s32.totalorder %v3048_v58, %v3052_v60  ;;  %v799_v59 = vadd.s32 80, %v3048_v58  ;;  %vm836_vm10 = vcmp.gt.s32.totalorder %v800_v57, %v3052_v60 }
 0x19d   : > { %v545_v62 = vpop.f32.mrb[5].mxu0  ;;  %1922 = vmatprep.mubr.f32.mxu0 %v543_v61  ;;  %v3060_v61 = vld [vmem:[%s303_s13] ss:$0 sm:$0xff] }
 0x19e   : > { %1978 = vmatprep.mubr.f32.mxu1 %v545_v62  ;;  %2310 = vmatpush3.bf16.msra.mxu0 %v2893_v3  ;;  %v2643_v62 = vmov 0.0   ;;  %vm835_vm11 = vcmp.gt.s32.totalorder %v799_v59, %v3052_v60 }
 0x19f   : > { %2342 = vmatpush3.bf16.msra.mxu1 %v2893_v3  ;;  %2312 = vmatprep.subr.bf16.mxu0 %v2901_v12  ;;  %v2998_v3 = vpop.f32.mrb[3].mxu1 }
 0x1a0   : > { %v549_v0 = vpop.f32.mrb[6].mxu0  ;;  %2344 = vmatprep.subr.bf16.mxu1 %v2901_v12  ;;  %v3002_v6 = vpop.f32.mrb[4].mxu1 }
 0x1a1   : > { %v551_v56 = vpop.f32.mrb[7].mxu0  ;;  %1923 = vmatmul.mubr.f32.gmra.mrb[34].mxu0 %v549_v0  ;;  %v3006_v8 = vpop.f32.mrb[5].mxu1  ;;  %v841_v0 = vsel %vm825_vm1, -1e+12, %v2643_v62 }
 0x1a2   : > { %1979 = vmatmul.mubr.f32.gmra.mrb[34].mxu1 %v551_v56  ;;  %2314 = vmatpush3.bf16.msra.mxu0 %v2901_v12  ;;  %v3010_v10 = vpop.f32.mrb[6].mxu1  ;;  %v791_v56 = vadd.s32 16, %v3048_v58 }
 0x1a3   : > { %2346 = vmatpush3.bf16.msra.mxu1 %v2901_v12  ;;  %2316 = vmatprep.subr.bf16.mxu0 %v2909_v18  ;;  %v3014_v12 = vpop.f32.mrb[7].mxu1 }
 0x1a4   : > { %v555_v4 = vpop.f32.mrb[8].mxu0  ;;  %2348 = vmatprep.subr.bf16.mxu1 %v2909_v18  ;;  %vm827_vm3 = vcmp.gt.s32.totalorder %v791_v56, %v3052_v60 }
 0x1a5   : > { %v557_v5 = vpop.f32.mrb[9].mxu0  ;;  %1925 = vmatprep.mubr.f32.mxu0 %v555_v4  ;;  %v3071_v4 = vadd.f32 %v3060_v61, %v841_v0 }
 0x1a6   : > { %1981 = vmatprep.mubr.f32.mxu1 %v557_v5  ;;  %2318 = vmatpush3.bf16.msra.mxu0 %v2909_v18  ;;  %v3018_v14 = vpop.f32.mrb[8].mxu1 }
 0x1a7   : > { %2350 = vmatpush3.bf16.msra.mxu1 %v2909_v18  ;;  %2320 = vmatprep.subr.bf16.mxu0 %v2918_v23  ;;  %v3022_v16 = vpop.f32.mrb[9].mxu1 }
 0x1a8   : > { %v561_v7 = vpop.f32.mrb[10].mxu0  ;;  %2352 = vmatprep.subr.bf16.mxu1 %v2918_v23 }
 0x1a9   : > { %v563_v9 = vpop.f32.mrb[11].mxu0  ;;  %1926 = vmatmul.mubr.f32.gmra.mrb[36].mxu0 %v561_v7 }
 0x1aa   : > { %1982 = vmatmul.mubr.f32.gmra.mrb[36].mxu1 %v563_v9  ;;  %2322 = vmatpush3.bf16.msra.mxu0 %v2918_v23  ;;  %v3026_v18 = vpop.f32.mrb[10].mxu1 }
 0x1ab   : > { %2354 = vmatpush3.bf16.msra.mxu1 %v2918_v23  ;;  %2324 = vmatprep.subr.bf16.mxu0 %v2928_v28  ;;  %v3030_v20 = vpop.f32.mrb[11].mxu1 }
 0x1ac   : > { %v567_v11 = vpop.f32.mrb[12].mxu0  ;;  %2356 = vmatprep.subr.bf16.mxu1 %v2928_v28 }
 0x1ad   : > { %v569_v13 = vpop.f32.mrb[13].mxu0  ;;  %1928 = vmatprep.mubr.f32.mxu0 %v567_v11 }
 0x1ae   : > { %1984 = vmatprep.mubr.f32.mxu1 %v569_v13  ;;  %2326 = vmatpush3.bf16.msra.mxu0 %v2928_v28  ;;  %v728_v22 = vpop.f32.mrb[12].mxu1  ;;  %v843_v13 = vsel %vm827_vm3, -1e+12, %v2643_v62 }
 0x1af   : > { %2358 = vmatpush3.bf16.msra.mxu1 %v2928_v28  ;;  %2328 = vmatprep.subr.bf16.mxu0 %v2938_v33  ;;  %v730_v24 = vpop.f32.mrb[13].mxu1 }
 0x1b0   : > { %v573_v15 = vpop.f32.mrb[14].mxu0  ;;  %2360 = vmatprep.subr.bf16.mxu1 %v2938_v33 }
 0x1b1   : > { %v575_v17 = vpop.f32.mrb[15].mxu0  ;;  %1929 = vmatmul.mubr.f32.gmra.mrb[38].mxu0 %v573_v15  ;;  %v793_v15 = vadd.s32 32, %v3048_v58 }
 0x1b2   : > { %1985 = vmatmul.mubr.f32.gmra.mrb[38].mxu1 %v575_v17  ;;  %2330 = vmatpush3.bf16.msra.mxu0 %v2938_v33  ;;  %v734_v26 = vpop.f32.mrb[14].mxu1  ;;  %v3093_v17 = vadd.f32 %v3060_v61, %v843_v13  ;;  %v801_v13 = vadd.s32 96, %v3048_v58 }
 0x1b3   : > { %2362 = vmatpush3.bf16.msra.mxu1 %v2938_v33  ;;  %2332 = vmatprep.subr.bf16.mxu0 %v2973_v55  ;;  %v736_v28 = vpop.f32.mrb[15].mxu1  ;;  %vm829_vm5 = vcmp.gt.s32.totalorder %v793_v15, %v3052_v60 }
 0x1b4   : > { %v579_v19 = vpop.f32.mrb[16].mxu0  ;;  %2364 = vmatprep.subr.bf16.mxu1 %v2973_v55  ;;  %vm837_vm13 = vcmp.gt.s32.totalorder %v801_v13, %v3052_v60 }
 0x1b5   : > { %v581_v21 = vpop.f32.mrb[17].mxu0  ;;  %1931 = vmatprep.mubr.f32.mxu0 %v579_v19 }
 0x1b6   : > { %1987 = vmatprep.mubr.f32.mxu1 %v581_v21  ;;  %2334 = vmatpush3.bf16.msra.mxu0 %v2973_v55  ;;  %v740_v30 = vpop.f32.mrb[16].mxu1 }
 0x1b7   : > { %2366 = vmatpush3.bf16.msra.mxu1 %v2973_v55  ;;  %v742_v32 = vpop.f32.mrb[17].mxu1 }
 0x1b8   : > { %v585_v23 = vpop.f32.mrb[18].mxu0 }
 0x1b9   : > { %v587_v25 = vpop.f32.mrb[19].mxu0  ;;  %1932 = vmatmul.mubr.f32.gmra.mrb[40].mxu0 %v585_v23 }
 0x1ba   : > { %1988 = vmatmul.mubr.f32.gmra.mrb[40].mxu1 %v587_v25  ;;  %v746_v34 = vpop.f32.mrb[18].mxu1 }
 0x1bb   : > { %v748_v36 = vpop.f32.mrb[19].mxu1 }
 0x1bc   : > { %v591_v27 = vpop.f32.mrb[20].mxu0 }
 0x1bd   : > { %v593_v29 = vpop.f32.mrb[21].mxu0  ;;  %1934 = vmatprep.mubr.f32.mxu0 %v591_v27  ;;  %v845_v27 = vsel %vm829_vm5, -1e+12, %v2643_v62 }
 0x1be   : > { %1990 = vmatprep.mubr.f32.mxu1 %v593_v29  ;;  %v752_v38 = vpop.f32.mrb[20].mxu1  ;;  %v795_v29 = vadd.s32 48, %v3048_v58 }
 0x1bf   : > { %v754_v40 = vpop.f32.mrb[21].mxu1 }
 0x1c0   : > { %v597_v31 = vpop.f32.mrb[22].mxu0  ;;  %vm831_vm7 = vcmp.gt.s32.totalorder %v795_v29, %v3052_v60  ;;  %v803_v29 = vadd.s32 112, %v3048_v58 }
 0x1c1   : > { %v599_v33 = vpop.f32.mrb[23].mxu0  ;;  %1935 = vmatmul.mubr.f32.gmra.mrb[42].mxu0 %v597_v31  ;;  %v3113_v31 = vadd.f32 %v3060_v61, %v845_v27  ;;  %v853_v27 = vsel %vm837_vm13, -1e+12, %v2643_v62 }
 0x1c2   : > { %1991 = vmatmul.mubr.f32.gmra.mrb[42].mxu1 %v599_v33  ;;  %v758_v42 = vpop.f32.mrb[22].mxu1  ;;  %vm839_vm15 = vcmp.gt.s32.totalorder %v803_v29, %v3052_v60 }
 0x1c3   : > { %v760_v44 = vpop.f32.mrb[23].mxu1 }
 0x1c4   : > { %v603_v35 = vpop.f32.mrb[24].mxu0 }
 0x1c5   : > { %v605_v37 = vpop.f32.mrb[25].mxu0  ;;  %1937 = vmatprep.mubr.f32.mxu0 %v603_v35 }
 0x1c6   : > { %1993 = vmatprep.mubr.f32.mxu1 %v605_v37  ;;  %v764_v46 = vpop.f32.mrb[24].mxu1 }
 0x1c7   : > { %v766_v48 = vpop.f32.mrb[25].mxu1 }
 0x1c8   : > { %v609_v39 = vpop.f32.mrb[26].mxu0 }
 0x1c9   : > { %v611_v41 = vpop.f32.mrb[27].mxu0  ;;  %1938 = vmatmul.mubr.f32.gmra.mrb[44].mxu0 %v609_v39 }
 0x1ca   : > { %1994 = vmatmul.mubr.f32.gmra.mrb[44].mxu1 %v611_v41  ;;  %v770_v50 = vpop.f32.mrb[26].mxu1  ;;  %v847_v41 = vsel %vm831_vm7, -1e+12, %v2643_v62 }
 0x1cb   : > { %v772_v51 = vpop.f32.mrb[27].mxu1 }
 0x1cc   : > { %v615_v43 = vpop.f32.mrb[28].mxu0 }
 0x1cd   : > { %v617_v45 = vpop.f32.mrb[29].mxu0  ;;  %1940 = vmatprep.mubr.f32.mxu0 %v615_v43  ;;  %v797_v43 = vadd.s32 64, %v3048_v58 }
 0x1ce   : > { %1996 = vmatprep.mubr.f32.mxu1 %v617_v45  ;;  %v776_v52 = vpop.f32.mrb[28].mxu1  ;;  %v3133_v45 = vadd.f32 %v3060_v61, %v847_v41 }
 0x1cf   : > { %v778_v53 = vpop.f32.mrb[29].mxu1  ;;  %vm833_vm9 = vcmp.gt.s32.totalorder %v797_v43, %v3052_v60 }
 0x1d0   : > { %v621_v47 = vpop.f32.mrb[30].mxu0 }
 0x1d1   : > { %v623_v49 = vpop.f32.mrb[31].mxu0  ;;  %1941 = vmatmul.mubr.f32.gmra.mrb[46].mxu0 %v621_v47 }
 0x1d2   : > { %1997 = vmatmul.mubr.f32.gmra.mrb[46].mxu1 %v623_v49  ;;  %2031 = vmatprep.mubr.f32.mxu0 %v2986_v63  ;;  %v782_v54 = vpop.f32.mrb[30].mxu1  ;;  %v842_v63 = vsel %vm826_vm0, -1e+12, %v2643_v62 }
 0x1d3   : > { %2087 = vmatprep.mubr.f32.mxu1 %v2990_v1  ;;  %v784_v55 = vpop.f32.mrb[31].mxu1  ;;  %v792_v1 = vadd.s32 24, %v3048_v58 }
 0x1d5   : > { %2032 = vmatmul.mubr.f32.vlgmr.msra.gmra.mrb[48].mxu0 %v2994_v2  ;;  %v3068_v2 = vadd.f32 %v3060_v61, %v842_v63  ;;  %vm828_vm2 = vcmp.gt.s32.totalorder %v792_v1, %v3052_v60 }
 0x1d6   : > { %2034 = vmatprep.mubr.f32.mxu0 %v3002_v6  ;;  %2088 = vmatmul.mubr.f32.vlgmr.msra.gmra.mrb[48].mxu1 %v2998_v3  ;;  %v844_v11 = vsel %vm828_vm2, -1e+12, %v2643_v62 }
 0x1d7   : > { %2090 = vmatprep.mubr.f32.mxu1 %v3006_v8 }
 0x1d9   : > { %2035 = vmatmul.mubr.f32.gmra.mrb[50].mxu0 %v3010_v10 }
 0x1da   : > { %2037 = vmatprep.mubr.f32.mxu0 %v3018_v14  ;;  %2091 = vmatmul.mubr.f32.gmra.mrb[50].mxu1 %v3014_v12  ;;  %v794_v14 = vadd.s32 40, %v3048_v58 }
 0x1db   : > { %2093 = vmatprep.mubr.f32.mxu1 %v3022_v16  ;;  %v3090_v16 = vadd.f32 %v3060_v61, %v844_v11  ;;  %v851_v11 = vsel %vm835_vm11, -1e+12, %v2643_v62 }
 0x1dc   : > { %vm830_vm4 = vcmp.gt.s32.totalorder %v794_v14, %v3052_v60  ;;  %v3173_v15 = vadd.f32 %v3060_v61, %v851_v11 }
 0x1dd   : > { %2038 = vmatmul.mubr.f32.gmra.mrb[52].mxu0 %v3026_v18  ;;  %v846_v25 = vsel %vm830_vm4, -1e+12, %v2643_v62 }
 0x1de   : > { %2040 = vmatprep.mubr.f32.mxu0 %v728_v22  ;;  %2094 = vmatmul.mubr.f32.gmra.mrb[52].mxu1 %v3030_v20 }
 0x1df   : > { %2096 = vmatprep.mubr.f32.mxu1 %v730_v24 }
 0x1e1   : > { %2041 = vmatmul.mubr.f32.gmra.mrb[54].mxu0 %v734_v26 }
 0x1e2   : > { %2043 = vmatprep.mubr.f32.mxu0 %v740_v30  ;;  %2097 = vmatmul.mubr.f32.gmra.mrb[54].mxu1 %v736_v28  ;;  %v796_v28 = vadd.s32 56, %v3048_v58  ;;  %v3110_v30 = vadd.f32 %v3060_v61, %v846_v25 }
 0x1e3   : > { %2099 = vmatprep.mubr.f32.mxu1 %v742_v32 }
 0x1e4   : > { %vm832_vm6 = vcmp.gt.s32.totalorder %v796_v28, %v3052_v60  ;;  %v804_v28 = vadd.s32 120, %v3048_v58 }
 0x1e5   : > { %2044 = vmatmul.mubr.f32.gmra.mrb[56].mxu0 %v746_v34  ;;  %v848_v39 = vsel %vm832_vm6, -1e+12, %v2643_v62 }
 0x1e6   : > { %2046 = vmatprep.mubr.f32.mxu0 %v752_v38  ;;  %2100 = vmatmul.mubr.f32.gmra.mrb[56].mxu1 %v748_v36  ;;  %vm840_vm14 = vcmp.gt.s32.totalorder %v804_v28, %v3052_v60 }
 0x1e7   : > { %2102 = vmatprep.mubr.f32.mxu1 %v754_v40 }
 0x1e9   : > { %2047 = vmatmul.mubr.f32.gmra.mrb[58].mxu0 %v758_v42  ;;  %v798_v42 = vadd.s32 72, %v3048_v58 }
 0x1ea   : > { %2049 = vmatprep.mubr.f32.mxu0 %v764_v46  ;;  %2103 = vmatmul.mubr.f32.gmra.mrb[58].mxu1 %v760_v44  ;;  %v3130_v44 = vadd.f32 %v3060_v61, %v848_v39 }
 0x1eb   : > { %2105 = vmatprep.mubr.f32.mxu1 %v766_v48  ;;  %vm834_vm8 = vcmp.gt.s32.totalorder %v798_v42, %v3052_v60  ;;  %v855_v42 = vsel %vm839_vm15, -1e+12, %v2643_v62 }
 0x1ec   : > { %v3211_v43 = vadd.f32 %v3060_v61, %v855_v42 }
 0x1ed   : > { %2050 = vmatmul.mubr.f32.gmra.mrb[60].mxu0 %v770_v50 }
 0x1ee   : > { %2052 = vmatprep.mubr.f32.mxu0 %v776_v52  ;;  %2106 = vmatmul.mubr.f32.gmra.mrb[60].mxu1 %v772_v51 }
 0x1ef   : > { %2108 = vmatprep.mubr.f32.mxu1 %v778_v53  ;;  %v850_v53 = vsel %vm834_vm8, -1e+12, %v2643_v62 }
 0x1f0   : > { %v3150_v63 = vadd.f32 %v3060_v61, %v850_v53 }
 0x1f1   : > { %2053 = vmatmul.mubr.f32.gmra.mrb[62].mxu0 %v782_v54 }
 0x1f2   : > { %2109 = vmatmul.mubr.f32.gmra.mrb[62].mxu1 %v784_v55  ;;  %v849_v55 = vsel %vm833_vm9, -1e+12, %v2643_v62 }
 0x1f3   : > { %v3153_v0 = vadd.f32 %v3060_v61, %v849_v55 }
 0x26c   : > { %v1921_v3 = vpop.f32.mrb[32].mxu0 }
 0x26d   : > { %v967_v5 = vadd.f32 %v1921_v3, %v3068_v2  ;;  %v961_v6 = vpop.f32.mrb[33].mxu0  ;;  %v1977_v7 = vpop.f32.mrb[32].mxu1 }
 0x26e   : > { %v962_v8 = vadd.f32 %v961_v6, %v3071_v4  ;;  %v1128_v9 = vadd.f32 %v1977_v7, %v3068_v2  ;;  %v1122_v10 = vpop.f32.mrb[33].mxu1 }
 0x26f   : > { %1041 = vst [vmem:[%s3079_s5 + $0x8] sm:$0xff] %v967_v5  ;;  %v1123_v12 = vadd.f32 %v1122_v10, %v3071_v4 }
 0x270   : > { %1040 = vst [vmem:[%s3079_s5] sm:$0xff] %v962_v8  ;;  %1704 = vst [vmem:[%s3079_s5 + $0x88] sm:$0xff] %v1128_v9  ;;  %v852_v9 = vsel %vm836_vm10, -1e+12, %v2643_v62 }
 0x271   : > { %1703 = vst [vmem:[%s3079_s5 + $0x80] sm:$0xff] %v1123_v12  ;;  %v802_v12 = vadd.s32 104, %v3048_v58  ;;  %v3170_v14 = vadd.f32 %v3060_v61, %v852_v9 }
 0x273   : > { %vm838_vm12 = vcmp.gt.s32.totalorder %v802_v12, %v3052_v60 }
 0x274   : > { %v1924_v18 = vpop.f32.mrb[34].mxu0  ;;  %v854_v25 = vsel %vm838_vm12, -1e+12, %v2643_v62 }
 0x275   : > { %v977_v19 = vadd.f32 %v1924_v18, %v3090_v16  ;;  %v971_v20 = vpop.f32.mrb[35].mxu0  ;;  %v1980_v21 = vpop.f32.mrb[34].mxu1 }
 0x276   : > { %v972_v22 = vadd.f32 %v971_v20, %v3093_v17  ;;  %v1138_v23 = vadd.f32 %v1980_v21, %v3090_v16  ;;  %v1132_v24 = vpop.f32.mrb[35].mxu1 }
 0x277   : > { %1043 = vst [vmem:[%s3079_s5 + $0x18] sm:$0xff] %v977_v19  ;;  %v1133_v26 = vadd.f32 %v1132_v24, %v3093_v17 }
 0x278   : > { %1042 = vst [vmem:[%s3079_s5 + $0x10] sm:$0xff] %v972_v22  ;;  %1706 = vst [vmem:[%s3079_s5 + $0x98] sm:$0xff] %v1138_v23 }
 0x279   : > { %1705 = vst [vmem:[%s3079_s5 + $0x90] sm:$0xff] %v1133_v26 }
 0x27c   : > { %v1927_v32 = vpop.f32.mrb[36].mxu0 }
 0x27d   : > { %v987_v33 = vadd.f32 %v1927_v32, %v3110_v30  ;;  %v981_v34 = vpop.f32.mrb[37].mxu0  ;;  %v1983_v35 = vpop.f32.mrb[36].mxu1  ;;  %v3190_v32 = vadd.f32 %v3060_v61, %v854_v25 }
 0x27e   : > { %v982_v36 = vadd.f32 %v981_v34, %v3113_v31  ;;  %v1148_v37 = vadd.f32 %v1983_v35, %v3110_v30  ;;  %v1142_v38 = vpop.f32.mrb[37].mxu1 }
 0x27f   : > { %1045 = vst [vmem:[%s3079_s5 + $0x28] sm:$0xff] %v987_v33  ;;  %v1143_v40 = vadd.f32 %v1142_v38, %v3113_v31  ;;  %v3193_v33 = vadd.f32 %v3060_v61, %v853_v27 }
 0x280   : > { %1044 = vst [vmem:[%s3079_s5 + $0x20] sm:$0xff] %v982_v36  ;;  %1708 = vst [vmem:[%s3079_s5 + $0xa8] sm:$0xff] %v1148_v37 }
 0x281   : > { %1707 = vst [vmem:[%s3079_s5 + $0xa0] sm:$0xff] %v1143_v40  ;;  %v856_v40 = vsel %vm840_vm14, -1e+12, %v2643_v62 }
 0x282   : > { %v3208_v60 = vadd.f32 %v3060_v61, %v856_v40 }
 0x284   : > { %v1930_v46 = vpop.f32.mrb[38].mxu0 }
 0x285   : > { %v997_v47 = vadd.f32 %v1930_v46, %v3130_v44  ;;  %v991_v48 = vpop.f32.mrb[39].mxu0  ;;  %v1986_v49 = vpop.f32.mrb[38].mxu1 }
 0x286   : > { %v992_v50 = vadd.f32 %v991_v48, %v3133_v45  ;;  %v1158_v51 = vadd.f32 %v1986_v49, %v3130_v44  ;;  %v1152_v52 = vpop.f32.mrb[39].mxu1 }
 0x287   : > { %1047 = vst [vmem:[%s3079_s5 + $0x38] sm:$0xff] %v997_v47  ;;  %v1153_v54 = vadd.f32 %v1152_v52, %v3133_v45 }
 0x288   : > { %1046 = vst [vmem:[%s3079_s5 + $0x30] sm:$0xff] %v992_v50  ;;  %1710 = vst [vmem:[%s3079_s5 + $0xb8] sm:$0xff] %v1158_v51 }
 0x289   : > { %1709 = vst [vmem:[%s3079_s5 + $0xb0] sm:$0xff] %v1153_v54 }
 0x28c   : > { %v1933_v1 = vpop.f32.mrb[40].mxu0 }
 0x28d   : > { %v1007_v56 = vadd.f32 %v1933_v1, %v3150_v63  ;;  %v1001_v3 = vpop.f32.mrb[41].mxu0  ;;  %v1989_v5 = vpop.f32.mrb[40].mxu1 }
 0x28e   : > { %v1002_v6 = vadd.f32 %v1001_v3, %v3153_v0  ;;  %v1168_v7 = vadd.f32 %v1989_v5, %v3150_v63  ;;  %v1162_v8 = vpop.f32.mrb[41].mxu1 }
 0x28f   : > { %1049 = vst [vmem:[%s3079_s5 + $0x48] sm:$0xff] %v1007_v56  ;;  %v1163_v10 = vadd.f32 %v1162_v8, %v3153_v0 }
 0x290   : > { %1048 = vst [vmem:[%s3079_s5 + $0x40] sm:$0xff] %v1002_v6  ;;  %1712 = vst [vmem:[%s3079_s5 + $0xc8] sm:$0xff] %v1168_v7 }
 0x291   : > { %1711 = vst [vmem:[%s3079_s5 + $0xc0] sm:$0xff] %v1163_v10 }
 0x294   : > { %v1936_v18 = vpop.f32.mrb[42].mxu0 }
 0x295   : > { %v1017_v19 = vadd.f32 %v1936_v18, %v3170_v14  ;;  %v1011_v20 = vpop.f32.mrb[43].mxu0  ;;  %v1992_v21 = vpop.f32.mrb[42].mxu1 }
 0x296   : > { %v1012_v22 = vadd.f32 %v1011_v20, %v3173_v15  ;;  %v1178_v23 = vadd.f32 %v1992_v21, %v3170_v14  ;;  %v1172_v24 = vpop.f32.mrb[43].mxu1 }
 0x297   : > { %1051 = vst [vmem:[%s3079_s5 + $0x58] sm:$0xff] %v1017_v19  ;;  %v1173_v26 = vadd.f32 %v1172_v24, %v3173_v15 }
 0x298   : > { %1050 = vst [vmem:[%s3079_s5 + $0x50] sm:$0xff] %v1012_v22  ;;  %1714 = vst [vmem:[%s3079_s5 + $0xd8] sm:$0xff] %v1178_v23 }
 0x299   : > { %1713 = vst [vmem:[%s3079_s5 + $0xd0] sm:$0xff] %v1173_v26 }
 0x29c   : > { %v1939_v34 = vpop.f32.mrb[44].mxu0 }
 0x29d   : > { %v1027_v35 = vadd.f32 %v1939_v34, %v3190_v32  ;;  %v1021_v36 = vpop.f32.mrb[45].mxu0  ;;  %v1995_v37 = vpop.f32.mrb[44].mxu1 }
 0x29e   : > { %v1022_v58 = vadd.f32 %v1021_v36, %v3193_v33  ;;  %v1188_v38 = vadd.f32 %v1995_v37, %v3190_v32  ;;  %v1182_v39 = vpop.f32.mrb[45].mxu1 }
 0x29f   : > { %1053 = vst [vmem:[%s3079_s5 + $0x68] sm:$0xff] %v1027_v35  ;;  %v1183_v41 = vadd.f32 %v1182_v39, %v3193_v33 }
 0x2a0   : > { %1052 = vst [vmem:[%s3079_s5 + $0x60] sm:$0xff] %v1022_v58  ;;  %1716 = vst [vmem:[%s3079_s5 + $0xe8] sm:$0xff] %v1188_v38 }
 0x2a1   : > { %1715 = vst [vmem:[%s3079_s5 + $0xe0] sm:$0xff] %v1183_v41 }
 0x2a4   : > { %v1942_v46 = vpop.f32.mrb[46].mxu0 }
 0x2a5   : > { %v1037_v47 = vadd.f32 %v1942_v46, %v3208_v60  ;;  %v1031_v48 = vpop.f32.mrb[47].mxu0  ;;  %v1998_v49 = vpop.f32.mrb[46].mxu1 }
 0x2a6   : > { %v1032_v50 = vadd.f32 %v1031_v48, %v3211_v43  ;;  %v1198_v62 = vadd.f32 %v1998_v49, %v3208_v60  ;;  %v1192_v51 = vpop.f32.mrb[47].mxu1 }
 0x2a7   : > { %1055 = vst [vmem:[%s3079_s5 + $0x78] sm:$0xff] %v1037_v47  ;;  %v1193_v52 = vadd.f32 %v1192_v51, %v3211_v43 }
 0x2a8   : > { %1054 = vst [vmem:[%s3079_s5 + $0x70] sm:$0xff] %v1032_v50  ;;  %1718 = vst [vmem:[%s3079_s5 + $0xf8] sm:$0xff] %v1198_v62  ;;  %v2033_v61 = vpop.f32.mrb[48].mxu0 }
 0x2a9   : > { %1717 = vst [vmem:[%s3079_s5 + $0xf0] sm:$0xff] %v1193_v52  ;;  %v1290_v53 = vadd.f32 %v2033_v61, %v3068_v2  ;;  %v1284_v54 = vpop.f32.mrb[49].mxu0  ;;  %v2089_v55 = vpop.f32.mrb[48].mxu1 }
 0x2aa   : > { %v1285_v57 = vadd.f32 %v1284_v54, %v3071_v4  ;;  %v1452_v59 = vadd.f32 %v2089_v55, %v3068_v2  ;;  %v1446_v1 = vpop.f32.mrb[49].mxu1 }
 0x2ab   : > { %1720 = vst [vmem:[%s3079_s5 + $0x108] sm:$0xff] %v1290_v53  ;;  %v1447_v56 = vadd.f32 %v1446_v1, %v3071_v4 }
 0x2ac   : > { %1719 = vst [vmem:[%s3079_s5 + $0x100] sm:$0xff] %v1285_v57  ;;  %1736 = vst [vmem:[%s3079_s5 + $0x188] sm:$0xff] %v1452_v59  ;;  %v2036_v3 = vpop.f32.mrb[50].mxu0 }
 0x2ad   : > { %1735 = vst [vmem:[%s3079_s5 + $0x180] sm:$0xff] %v1447_v56  ;;  %v1300_v5 = vadd.f32 %v2036_v3, %v3090_v16  ;;  %v1294_v6 = vpop.f32.mrb[51].mxu0  ;;  %v2092_v7 = vpop.f32.mrb[50].mxu1 }
 0x2ae   : > { %v1295_v8 = vadd.f32 %v1294_v6, %v3093_v17  ;;  %v1462_v2 = vadd.f32 %v2092_v7, %v3090_v16  ;;  %v1456_v9 = vpop.f32.mrb[51].mxu1 }
 0x2af   : > { %1722 = vst [vmem:[%s3079_s5 + $0x118] sm:$0xff] %v1300_v5  ;;  %v1457_v4 = vadd.f32 %v1456_v9, %v3093_v17 }
 0x2b0   : > { %1721 = vst [vmem:[%s3079_s5 + $0x110] sm:$0xff] %v1295_v8  ;;  %1738 = vst [vmem:[%s3079_s5 + $0x198] sm:$0xff] %v1462_v2  ;;  %v2039_v10 = vpop.f32.mrb[52].mxu0 }
 0x2b1   : > { %1737 = vst [vmem:[%s3079_s5 + $0x190] sm:$0xff] %v1457_v4  ;;  %v1310_v11 = vadd.f32 %v2039_v10, %v3110_v30  ;;  %v1304_v12 = vpop.f32.mrb[53].mxu0  ;;  %v2095_v13 = vpop.f32.mrb[52].mxu1 }
 0x2b2   : > { %v1305_v18 = vadd.f32 %v1304_v12, %v3113_v31  ;;  %v1472_v16 = vadd.f32 %v2095_v13, %v3110_v30  ;;  %v1466_v19 = vpop.f32.mrb[53].mxu1 }
 0x2b3   : > { %1724 = vst [vmem:[%s3079_s5 + $0x128] sm:$0xff] %v1310_v11  ;;  %v1467_v17 = vadd.f32 %v1466_v19, %v3113_v31 }
 0x2b4   : > { %1723 = vst [vmem:[%s3079_s5 + $0x120] sm:$0xff] %v1305_v18  ;;  %1740 = vst [vmem:[%s3079_s5 + $0x1a8] sm:$0xff] %v1472_v16  ;;  %v2042_v20 = vpop.f32.mrb[54].mxu0 }
 0x2b5   : > { %1739 = vst [vmem:[%s3079_s5 + $0x1a0] sm:$0xff] %v1467_v17  ;;  %v1320_v21 = vadd.f32 %v2042_v20, %v3130_v44  ;;  %v1314_v22 = vpop.f32.mrb[55].mxu0  ;;  %v2098_v23 = vpop.f32.mrb[54].mxu1 }
 0x2b6   : > { %v1315_v24 = vadd.f32 %v1314_v22, %v3133_v45  ;;  %v1482_v30 = vadd.f32 %v2098_v23, %v3130_v44  ;;  %v1476_v25 = vpop.f32.mrb[55].mxu1 }
 0x2b7   : > { %1726 = vst [vmem:[%s3079_s5 + $0x138] sm:$0xff] %v1320_v21  ;;  %v1477_v31 = vadd.f32 %v1476_v25, %v3133_v45 }
 0x2b8   : > { %1725 = vst [vmem:[%s3079_s5 + $0x130] sm:$0xff] %v1315_v24  ;;  %1742 = vst [vmem:[%s3079_s5 + $0x1b8] sm:$0xff] %v1482_v30  ;;  %v2045_v26 = vpop.f32.mrb[56].mxu0 }
 0x2b9   : > { %1741 = vst [vmem:[%s3079_s5 + $0x1b0] sm:$0xff] %v1477_v31  ;;  %v1330_v27 = vadd.f32 %v2045_v26, %v3150_v63  ;;  %v1324_v28 = vpop.f32.mrb[57].mxu0  ;;  %v2101_v29 = vpop.f32.mrb[56].mxu1 }
 0x2ba   : > { %v1325_v34 = vadd.f32 %v1324_v28, %v3153_v0  ;;  %v1492_v44 = vadd.f32 %v2101_v29, %v3150_v63  ;;  %v1486_v35 = vpop.f32.mrb[57].mxu1 }
 0x2bb   : > { %1728 = vst [vmem:[%s3079_s5 + $0x148] sm:$0xff] %v1330_v27  ;;  %v1487_v45 = vadd.f32 %v1486_v35, %v3153_v0 }
 0x2bc   : > { %1727 = vst [vmem:[%s3079_s5 + $0x140] sm:$0xff] %v1325_v34  ;;  %1744 = vst [vmem:[%s3079_s5 + $0x1c8] sm:$0xff] %v1492_v44  ;;  %v2048_v36 = vpop.f32.mrb[58].mxu0 }
 0x2bd   : > { %1743 = vst [vmem:[%s3079_s5 + $0x1c0] sm:$0xff] %v1487_v45  ;;  %v1340_v37 = vadd.f32 %v2048_v36, %v3170_v14  ;;  %v1334_v58 = vpop.f32.mrb[59].mxu0  ;;  %v2104_v38 = vpop.f32.mrb[58].mxu1 }
 0x2be   : > { %v1335_v39 = vadd.f32 %v1334_v58, %v3173_v15  ;;  %v1502_v63 = vadd.f32 %v2104_v38, %v3170_v14  ;;  %v1496_v40 = vpop.f32.mrb[59].mxu1 }
 0x2bf   : > { %1730 = vst [vmem:[%s3079_s5 + $0x158] sm:$0xff] %v1340_v37  ;;  %v1497_v0 = vadd.f32 %v1496_v40, %v3173_v15 }
 0x2c0   : > { %1729 = vst [vmem:[%s3079_s5 + $0x150] sm:$0xff] %v1335_v39  ;;  %1746 = vst [vmem:[%s3079_s5 + $0x1d8] sm:$0xff] %v1502_v63  ;;  %v2051_v41 = vpop.f32.mrb[60].mxu0 }
 0x2c1   : > { %1745 = vst [vmem:[%s3079_s5 + $0x1d0] sm:$0xff] %v1497_v0  ;;  %v1350_v42 = vadd.f32 %v2051_v41, %v3190_v32  ;;  %v1344_v46 = vpop.f32.mrb[61].mxu0  ;;  %v2107_v47 = vpop.f32.mrb[60].mxu1 }
 0x2c2   : > { %v1345_v48 = vadd.f32 %v1344_v46, %v3193_v33  ;;  %v1512_v14 = vadd.f32 %v2107_v47, %v3190_v32  ;;  %v1506_v49 = vpop.f32.mrb[61].mxu1 }
 0x2c3   : > { %1732 = vst [vmem:[%s3079_s5 + $0x168] sm:$0xff] %v1350_v42  ;;  %v1507_v50 = vadd.f32 %v1506_v49, %v3193_v33 }
 0x2c4   : > { %1731 = vst [vmem:[%s3079_s5 + $0x160] sm:$0xff] %v1345_v48  ;;  %1748 = vst [vmem:[%s3079_s5 + $0x1e8] sm:$0xff] %v1512_v14  ;;  %v2054_v15 = vpop.f32.mrb[62].mxu0 }
 0x2c5   : > { %1747 = vst [vmem:[%s3079_s5 + $0x1e0] sm:$0xff] %v1507_v50  ;;  %v1360_v62 = vadd.f32 %v2054_v15, %v3208_v60  ;;  %v1354_v51 = vpop.f32.mrb[63].mxu0  ;;  %v2110_v32 = vpop.f32.mrb[62].mxu1 }
 0x2c6   : > { %v1355_v52 = vadd.f32 %v1354_v51, %v3211_v43  ;;  %v1522_v61 = vadd.f32 %v2110_v32, %v3208_v60  ;;  %v1516_v33 = vpop.f32.mrb[63].mxu1 }
 0x2c7   : > { %1734 = vst [vmem:[%s3079_s5 + $0x178] sm:$0xff] %v1360_v62  ;;  %v1517_v53 = vadd.f32 %v1516_v33, %v3211_v43 }
 0x2c8   : > { %1733 = vst [vmem:[%s3079_s5 + $0x170] sm:$0xff] %v1355_v52  ;;  %1750 = vst [vmem:[%s3079_s5 + $0x1f8] sm:$0xff] %v1522_v61 }
 0x2c9   : > { %1749 = vst [vmem:[%s3079_s5 + $0x1f0] sm:$0xff] %v1517_v53 }
 0x2ca   : > { %2555 = shalt.err (!%p2552_p11)
}
 0x2cb   : > { %s2556_s0 = scalar_lea.hbm %s3285_s10, 8192  ;;  %s2560_s14 = scalar_lea.hbm %s3345_s4, 16384 }
 0x2cc   : > { %p2557_p12 = scmp.ne.s32.totalorder %s3285_s10, %s2556_s0  ;;  %p2561_p13 = scmp.lt.u32.totalorder %s3285_s10, %s3345_s4 }
 0x2cd   : > { %p2562_p0 = scmp.lt.u32.totalorder %s2560_s14, %s2556_s0  ;;  %p2564_p9 = scmp.lt.u32.totalorder %s2556_s0, %s3285_s10 }
 0x2ce   : > { %p2558_p3 = pnand %p2557_p12, %p2764_p10 }
 0x2cf   : > { %p2563_p5 = por %p2562_p0, %p2561_p13 }
 0x2d0   : > { %p2559_p6 = pneg %p2558_p3 }
 0x2d1   : > { %p2565_p1 = por %p2564_p9, %p2563_p5 }
 0x2d3   : > { %p2566_p2 = pnand %p2565_p1, %p2559_p6 }
 0x2d5   : > { %2569 = shalt.err (!%p2566_p2)
}
 0x2d6   : > { %s2645_s9 = smov 128   ;;  %s2646_s13 = smov 8  }
 0x2d7   : > { %2375 = dma.vmem_to_hbm [thread:$0]  (%p2764_p10), %s3287_s22, 8192, %s3285_s10, %s1543_s7, %s2645_s9, %s2645_s9, %s2646_s13  }
 0x2d8 PF: > { %s1573_s26 = sand.u32 1, %s2612_s15   ;;  %p3369_p7 = scmp.ne.s32.totalorder %s3353_s24, 0 }
 0x2d9   : > { %p3370_p4 = scmp.ge.s32.totalorder %s2632_s20, 2  ;;  %s1574_s5 = scalar_lea.sflag [#allocation4], %s1573_s26 }
 0x2db   : > { %p2389_p8 = pnand %p3370_p4, %p3369_p7 }
 0x2dd   : > { %2607 = dma.done.wait (!%p2389_p8), %s1574_s5, 8192  }
 0x2de   : > { %2609 = vsyncadd (!%p2389_p8), %s1574_s5, 4294959104  ;;  %s23_s20 = sadd.s32 1, %s2632_s20   ;;  %s3371_s3 = sld [smem:[#allocation14_spill]] }
 0x2df   : > { %p20_p11 = scmp.ge.s32.totalorder %s23_s20, 4   ;;  %s3372_s28 = sld [smem:[#allocation13_spill]] }
 0x2e0   : > { %s3373_s15 = smov %s2616_s16  ;;  %s3374_s16 = smov %s2620_s17 }
 0x2e1   : > { %s3376_s18 = smov %s2628_s19  ;;  %22 = sbr.rel (!%p20_p11) target bundleno = 11 (0xb), region = 104 }
 0x2e4   : > { %s3375_s17 = smov %s3371_s3 }
 0x2e5   : > { %s3377_s19 = smov %s3372_s28 }
 0x2e8   :  { %1579 = vsyncpa [#allocation3], 1 }
 0x2e9   :  { %1581 = vsyncpa [#allocation3 + $0x1], 1 }
 0x2ea   :  { %1582 = vsyncpa [#allocation6], 1 }
 0x2eb   :  { %1584 = vsyncpa [#allocation6 + $0x1], 1 }
 0x2ec   :  { %1585 = vsyncpa [#allocation4], 1 }
 0x2ed   :  { %1587 = vsyncpa [#allocation4 + $0x1], 1 }

</bundles_post_ra>
